<compile_context>
chip_gen: v7x
topology: tpu7x:2x2x1
jax: 0.10.0
libtpu: 0.0.40
codegen_flags: <defaults>
</compile_context>

<pallas_src>
import functools

import jax
import jax.numpy as jnp
from jax import lax
from jax.experimental import pallas as pl
from jax.experimental.pallas import tpu as pltpu


# ----------------------------------------------------------------------------
# Fused kernel: full_1 -> InstanceNorm1d -> GRU -> full_2 -> InstanceNorm1d ->
# tanh -> Decoder(sigmoid Linear) -> NeuralCDM prednet -> [1-p, p].
# Whole arrays are VMEM resident (grid = ()); shapes are tiny.
# ----------------------------------------------------------------------------
def fused_model_kernel(
    x_ref,                   # (N, 2K)  rnn input, time-major rows r = t*B + b
    w1_ref, b1_ref,          # full_1: (2K, H), (1, H)
    inorm_ref,               # (N, 4)   per-row [in1_w, in1_b, in2_w, in2_b]
    wih_ref, whh_ref,        # GRU weights, gates [r|z|n]: (H, 3H) each
    bg_ref,                  # GRU biases: (2, 3H), row0 = b_ih, row1 = b_hh
    w2_ref, b2_ref,          # full_2: (H, H), (1, H)
    wd_ref, bd_ref,          # decoder: (H, K), (1, K)
    kd_ref, ed_ref, kr_ref,  # prednet inputs: (N, K), (N, 1), (N, K); kd/ed pre-sigmoided
    p1w_ref, p1b_ref,        # prednet_full1: (K, 512), (1, 512)
    p2w_ref, p2b_ref,        # prednet_full2: (512, 256), (1, 256)
    w3c_ref, b3c_ref,        # prednet_full3 folded: (256, 2) = [-w3 | w3], (1, 2)
    out_ref,                 # (N, 2) = [1 - p, p]
    *, T, B,
):
    H = w1_ref.shape[1]
    eps = 1e-5

    inorm = inorm_ref[...]

    def inst_norm(h, w, b):
        # Normalize over the feature (lane) dim per row; one-pass statistics.
        inv_n = 1.0 / h.shape[-1]
        mean = jnp.sum(h, axis=-1, keepdims=True) * inv_n
        msq = jnp.sum(h * h, axis=-1, keepdims=True) * inv_n
        var = jnp.maximum(msq - mean * mean, 0.0)
        return (h - mean) * lax.rsqrt(var + eps) * w + b

    # ---- TransitionRNN: full_1 + InstanceNorm1d #1 --------------------------
    h1 = jnp.dot(x_ref[...], w1_ref[...],
                 preferred_element_type=jnp.float32) + b1_ref[...]
    xin = inst_norm(h1, inorm[:, 0:1], inorm[:, 1:2])              # (N, H)

    # ---- GRU: fused gate projections + statically unrolled recurrence -------
    bih = bg_ref[0:1, :]
    bhh = bg_ref[1:2, :]
    gx = jnp.dot(xin, wih_ref[...],
                 preferred_element_type=jnp.float32) + bih         # (N, 3H)
    gx3 = gx.reshape(T, B, 3 * H)
    whh = whh_ref[...]

    h = jnp.zeros((B, H), jnp.float32)
    hs_list = []
    for t in range(T):                                             # static unroll
        gxt = gx3[t]                                               # (B, 3H)
        gh = jnp.dot(h, whh, preferred_element_type=jnp.float32) + bhh
        rz = jax.nn.sigmoid(gxt[:, :2 * H] + gh[:, :2 * H])        # one sigmoid, 2H lanes
        r = rz[:, :H]
        z = rz[:, H:]
        n = jnp.tanh(gxt[:, 2 * H:] + r * gh[:, 2 * H:])
        h = (1.0 - z) * n + z * h
        hs_list.append(h)
    hs = jnp.stack(hs_list, axis=0).reshape(T * B, H)              # (N, H)

    # ---- full_2 + InstanceNorm1d #2 + tanh, then Decoder ---------------------
    h2 = jnp.dot(hs, w2_ref[...],
                 preferred_element_type=jnp.float32) + b2_ref[...]
    ho = jnp.tanh(inst_norm(h2, inorm[:, 2:3], inorm[:, 3:4]))
    lo = jax.nn.sigmoid(jnp.dot(ho, wd_ref[...],
                                preferred_element_type=jnp.float32) + bd_ref[...])

    # ---- NeuralCDM prednet (dropout = identity, eval mode) -------------------
    xc = ed_ref[...] * (lo - kd_ref[...]) * kr_ref[...]            # (N, K)
    hc1 = jnp.tanh(jnp.dot(xc, p1w_ref[...],
                           preferred_element_type=jnp.float32) + p1b_ref[...])
    hc2 = jnp.tanh(jnp.dot(hc1, p2w_ref[...],
                           preferred_element_type=jnp.float32) + p2b_ref[...])
    # sigmoid([-z, z]) == [1 - p, p]  -> one matmul, one dense store.
    out_ref[...] = jax.nn.sigmoid(
        jnp.dot(hc2, w3c_ref[...],
                preferred_element_type=jnp.float32) + b3c_ref[...])


def fused_forward(x_tm, inorm, kd_tm, ed_tm, kr_tm, p, *, T, B):
    N = T * B
    args = [
        x_tm, p["w1"], p["b1"], inorm,
        p["wih"], p["whh"], p["b_gru"],
        p["w2"], p["b2"], p["wd"], p["bd"],
        kd_tm, ed_tm, kr_tm,
        p["p1_w"], p["p1_b"], p["p2_w"], p["p2_b"],
        p["w3_cat"], p["b3_cat"],
    ]
    return pl.pallas_call(
        functools.partial(fused_model_kernel, T=T, B=B),
        out_shape=jax.ShapeDtypeStruct((N, 2), jnp.float32),
        in_specs=[pl.BlockSpec(memory_space=pltpu.MemorySpace.VMEM)] * len(args),
        out_specs=pl.BlockSpec(memory_space=pltpu.MemorySpace.VMEM),
    )(*args)
    # TODO(synk): at production N, row-block the prednet tail with a parallel
    # grid (v7x second TensorCore) and bf16 weights; unnecessary at toy shapes.


# ----------------------------------------------------------------------------
# Model glue (plain JAX): rnn_input construction, embedding gathers, layout.
# ----------------------------------------------------------------------------
@jax.jit
def model_forward(params, stu_id, exer_id, knowledge_relevancy, corrs):
    del stu_id  # unused on the attr_idx=2 / stage=1 forward path
    B, S, K = knowledge_relevancy.shape
    T = S - 1

    # __get_state (attr_idx=2 / stage=1): scatter knowledge_relevancy into the
    # [incorrect | correct] halves of the 2K-wide rnn input.
    kr_head = knowledge_relevancy[:, :T, :].astype(jnp.float32)        # (B, T, K)
    c = corrs[:, :, None]
    rnn_input = jnp.concatenate(
        [jnp.where(c == 0, kr_head, 0.0), jnp.where(c == 1, kr_head, 0.0)],
        axis=-1)                                                       # (B, T, 2K)
    x_tm = jnp.transpose(rnn_input, (1, 0, 2)).reshape(T * B, 2 * K)   # time-major

    # InstanceNorm1d(batch_size) affine params, tiled per time-major row.
    inorm = jnp.tile(
        jnp.concatenate([params["in1_w"], params["in1_b"],
                         params["in2_w"], params["in2_b"]], axis=1), (T, 1))

    # Per-exercise sigmoids once over the (exer_n, .) tables, then gather.
    kd_tab = jax.nn.sigmoid(params["k_difficulty"])                    # (E, K)
    ed_tab = jax.nn.sigmoid(params["e_discrimination"])                # (E, 1)
    exer_tail = exer_id[:, 1:]                                         # (B, T)
    kd_tm = jnp.transpose(kd_tab[exer_tail], (1, 0, 2)).reshape(T * B, K)
    ed_tm = jnp.transpose(ed_tab[exer_tail], (1, 0, 2)).reshape(T * B, 1)
    kr_tm = jnp.transpose(knowledge_relevancy[:, 1:, :].astype(jnp.float32),
                          (1, 0, 2)).reshape(T * B, K)

    out_tm = fused_forward(x_tm, inorm, kd_tm, ed_tm, kr_tm, params, T=T, B=B)
    return out_tm.reshape(T, B, 2).transpose(1, 0, 2)                  # (B, T, 2)


# ----------------------------------------------------------------------------
# Deterministic parameter initialization (shapes follow the PyTorch module;
# Linear weights stored already transposed as (in, out)) + packing.
# ----------------------------------------------------------------------------
def init_params(key, K, H, exer_n, B):
    L1, L2 = 512, 256
    keys = iter(jax.random.split(key, 32))

    def xavier(shape):
        fan_in, fan_out = shape[0], shape[-1]
        std = (2.0 / (fan_in + fan_out)) ** 0.5
        return std * jax.random.normal(next(keys), shape, jnp.float32)

    def small(shape, scale=0.1):
        return scale * jax.random.normal(next(keys), shape, jnp.float32)

    p = {}
    # TransitionRNN
    p["w1"] = xavier((2 * K, H)); p["b1"] = small((1, H))
    p["in1_w"] = 1.0 + small((B, 1)); p["in1_b"] = small((B, 1))
    for g in ("r", "z", "n"):
        p[f"wih_{g}"] = xavier((H, H)); p[f"whh_{g}"] = xavier((H, H))
        p[f"bih_{g}"] = small((1, H));  p[f"bhh_{g}"] = small((1, H))
    p["w2"] = xavier((H, H)); p["b2"] = small((1, H))
    p["in2_w"] = 1.0 + small((B, 1)); p["in2_b"] = small((B, 1))
    # Decoder
    p["wd"] = xavier((H, K)); p["bd"] = small((1, K))
    # NeuralCDM
    p["k_difficulty"] = xavier((exer_n, K))
    p["e_discrimination"] = xavier((exer_n, 1))
    p["p1_w"] = xavier((K, L1)); p["p1_b"] = small((1, L1))
    p["p2_w"] = xavier((L1, L2)); p["p2_b"] = small((1, L2))
    p["p3_w"] = xavier((L2, 1)); p["p3_b"] = small((1, 1))
    return p


def pack_params(p):
    """One-time packing of small parameter arrays into wider kernel slabs."""
    q = dict(p)
    q["wih"] = jnp.concatenate([p["wih_r"], p["wih_z"], p["wih_n"]], axis=1)   # (H, 3H)
    q["whh"] = jnp.concatenate([p["whh_r"], p["whh_z"], p["whh_n"]], axis=1)   # (H, 3H)
    q["b_gru"] = jnp.concatenate(
        [jnp.concatenate([p["bih_r"], p["bih_z"], p["bih_n"]], axis=1),
         jnp.concatenate([p["bhh_r"], p["bhh_z"], p["bhh_n"]], axis=1)],
        axis=0)                                                                 # (2, 3H)
    # Fold [1 - p, p] into the last Linear: sigmoid(-z) == 1 - sigmoid(z).
    q["w3_cat"] = jnp.concatenate([-p["p3_w"], p["p3_w"]], axis=1)              # (256, 2)
    q["b3_cat"] = jnp.concatenate([-p["p3_b"], p["p3_b"]], axis=1)              # (1, 2)
    return q


if __name__ == "__main__":
    # Small shapes consistent with the module:
    #   batch_size=4, max_log(seq_len)=9, knowledge_n=16, exer_n=20, stu_ho_dim=32
    B, S, K, H, E = 4, 9, 16, 32, 20
    key = jax.random.PRNGKey(0)
    k1, k2, k3, kp = jax.random.split(key, 4)

    stu_id = jnp.arange(B, dtype=jnp.int32)
    exer_id = jax.random.randint(k1, (B, S), 0, E, dtype=jnp.int32)
    knowledge_relevancy = (jax.random.uniform(k2, (B, S, K)) > 0.5).astype(jnp.float32)
    corrs = jax.random.randint(k3, (B, S - 1), 0, 2, dtype=jnp.int32)

    params = pack_params(init_params(kp, K, H, E, B))

    out = model_forward(params, stu_id, exer_id, knowledge_relevancy, corrs)
    out = jax.block_until_ready(out)

    assert out.shape == (B, S - 1, 2), out.shape
    assert bool(jnp.all(jnp.isfinite(out)))
    # rows sum to 1 (output = [1 - p, p])
    assert bool(jnp.allclose(out.sum(-1), 1.0, atol=1e-5))
    print("KERNEL_OK")
</pallas_src>

<mosaic_0001>
module attributes {stable_mosaic.version = 11 : i64} {
  func.func @fused_model_kernel(%arg0: memref<32x32xf32, #tpu.memory_space<vmem>>, %arg1: memref<32x32xf32, #tpu.memory_space<vmem>>, %arg2: memref<1x32xf32, #tpu.memory_space<vmem>>, %arg3: memref<32x4xf32, #tpu.memory_space<vmem>>, %arg4: memref<32x96xf32, #tpu.memory_space<vmem>>, %arg5: memref<32x96xf32, #tpu.memory_space<vmem>>, %arg6: memref<2x96xf32, #tpu.memory_space<vmem>>, %arg7: memref<32x32xf32, #tpu.memory_space<vmem>>, %arg8: memref<1x32xf32, #tpu.memory_space<vmem>>, %arg9: memref<32x16xf32, #tpu.memory_space<vmem>>, %arg10: memref<1x16xf32, #tpu.memory_space<vmem>>, %arg11: memref<32x16xf32, #tpu.memory_space<vmem>>, %arg12: memref<32x1xf32, #tpu.memory_space<vmem>>, %arg13: memref<32x16xf32, #tpu.memory_space<vmem>>, %arg14: memref<16x512xf32, #tpu.memory_space<vmem>>, %arg15: memref<1x512xf32, #tpu.memory_space<vmem>>, %arg16: memref<512x256xf32, #tpu.memory_space<vmem>>, %arg17: memref<1x256xf32, #tpu.memory_space<vmem>>, %arg18: memref<256x2xf32, #tpu.memory_space<vmem>>, %arg19: memref<1x2xf32, #tpu.memory_space<vmem>>, %arg20: memref<32x2xf32, #tpu.memory_space<vmem>>) attributes {dimension_semantics = [], scalar_prefetch = 0 : i64, scratch_operands = 0 : i64, tpu.core_type = #tpu.core_type<tc>} {
    %c0 = arith.constant 0 : index
    %c0_0 = arith.constant 0 : index
    %0 = vector.load %arg3[%c0, %c0_0] : memref<32x4xf32, #tpu.memory_space<vmem>>, vector<32x4xf32>
    %c0_1 = arith.constant 0 : index
    %c0_2 = arith.constant 0 : index
    %1 = vector.load %arg0[%c0_1, %c0_2] : memref<32x32xf32, #tpu.memory_space<vmem>>, vector<32x32xf32>
    %c0_3 = arith.constant 0 : index
    %c0_4 = arith.constant 0 : index
    %2 = vector.load %arg1[%c0_3, %c0_4] : memref<32x32xf32, #tpu.memory_space<vmem>>, vector<32x32xf32>
    %cst = arith.constant dense<0.000000e+00> : vector<32x32xf32>
    %3 = tpu.matmul %1, %2, %cst {dimension_numbers = #tpu.dot_dimension_numbers<[1], [0], [0], [1], [0, 0, 1, 1], [], []>} : vector<32x32xf32>, vector<32x32xf32>, vector<32x32xf32> -> vector<32x32xf32>
    %c0_5 = arith.constant 0 : index
    %c0_6 = arith.constant 0 : index
    %4 = vector.load %arg2[%c0_5, %c0_6] : memref<1x32xf32, #tpu.memory_space<vmem>>, vector<1x32xf32>
    %5 = vector.broadcast %4 : vector<1x32xf32> to vector<32x32xf32>
    %6 = arith.addf %3, %5 : vector<32x32xf32>
    %7 = vector.extract_strided_slice %0 {offsets = [0, 0], sizes = [32, 1], strides = [1, 1]} : vector<32x4xf32> to vector<32x1xf32>
    %8 = vector.extract_strided_slice %0 {offsets = [0, 1], sizes = [32, 1], strides = [1, 1]} : vector<32x4xf32> to vector<32x1xf32>
    %cst_7 = arith.constant dense<0.000000e+00> : vector<32xf32>
    %9 = vector.multi_reduction <add>, %6, %cst_7 [1] : vector<32x32xf32> to vector<32xf32>
    %10 = vector.shape_cast %9 : vector<32xf32> to vector<32x1xf32>
    %cst_8 = arith.constant 3.125000e-02 : f32
    %11 = vector.broadcast %cst_8 : f32 to vector<32x1xf32>
    %12 = arith.mulf %10, %11 : vector<32x1xf32>
    %13 = arith.mulf %6, %6 : vector<32x32xf32>
    %cst_9 = arith.constant dense<0.000000e+00> : vector<32xf32>
    %14 = vector.multi_reduction <add>, %13, %cst_9 [1] : vector<32x32xf32> to vector<32xf32>
    %15 = vector.shape_cast %14 : vector<32xf32> to vector<32x1xf32>
    %cst_10 = arith.constant 3.125000e-02 : f32
    %16 = vector.broadcast %cst_10 : f32 to vector<32x1xf32>
    %17 = arith.mulf %15, %16 : vector<32x1xf32>
    %18 = arith.mulf %12, %12 : vector<32x1xf32>
    %19 = arith.subf %17, %18 : vector<32x1xf32>
    %cst_11 = arith.constant 0.000000e+00 : f32
    %20 = vector.broadcast %cst_11 : f32 to vector<32x1xf32>
    %21 = arith.maximumf %19, %20 : vector<32x1xf32>
    %22 = vector.broadcast %12 : vector<32x1xf32> to vector<32x32xf32>
    %23 = arith.subf %6, %22 : vector<32x32xf32>
    %cst_12 = arith.constant 9.99999974E-6 : f32
    %24 = vector.broadcast %cst_12 : f32 to vector<32x1xf32>
    %25 = arith.addf %21, %24 : vector<32x1xf32>
    %26 = math.rsqrt %25 : vector<32x1xf32>
    %27 = vector.broadcast %26 : vector<32x1xf32> to vector<32x32xf32>
    %28 = arith.mulf %23, %27 : vector<32x32xf32>
    %29 = vector.broadcast %7 : vector<32x1xf32> to vector<32x32xf32>
    %30 = arith.mulf %28, %29 : vector<32x32xf32>
    %31 = vector.broadcast %8 : vector<32x1xf32> to vector<32x32xf32>
    %32 = arith.addf %30, %31 : vector<32x32xf32>
    %c0_13 = arith.constant 0 : index
    %c0_14 = arith.constant 0 : index
    %33 = vector.load %arg6[%c0_13, %c0_14] : memref<2x96xf32, #tpu.memory_space<vmem>>, vector<1x96xf32>
    %c1 = arith.constant 1 : index
    %c0_15 = arith.constant 0 : index
    %34 = vector.load %arg6[%c1, %c0_15] : memref<2x96xf32, #tpu.memory_space<vmem>>, vector<1x96xf32>
    %c0_16 = arith.constant 0 : index
    %c0_17 = arith.constant 0 : index
    %35 = vector.load %arg4[%c0_16, %c0_17] : memref<32x96xf32, #tpu.memory_space<vmem>>, vector<32x96xf32>
    %cst_18 = arith.constant dense<0.000000e+00> : vector<32x96xf32>
    %36 = tpu.matmul %32, %35, %cst_18 {dimension_numbers = #tpu.dot_dimension_numbers<[1], [0], [0], [1], [0, 0, 1, 1], [], []>} : vector<32x32xf32>, vector<32x96xf32>, vector<32x96xf32> -> vector<32x96xf32>
    %37 = vector.broadcast %33 : vector<1x96xf32> to vector<32x96xf32>
    %38 = arith.addf %36, %37 : vector<32x96xf32>
    %39 = vector.shape_cast %38 : vector<32x96xf32> to vector<8x4x96xf32>
    %c0_19 = arith.constant 0 : index
    %c0_20 = arith.constant 0 : index
    %40 = vector.load %arg5[%c0_19, %c0_20] : memref<32x96xf32, #tpu.memory_space<vmem>>, vector<32x96xf32>
    %cst_21 = arith.constant 0.000000e+00 : f32
    %41 = vector.broadcast %cst_21 : f32 to vector<4x32xf32>
    %42 = vector.extract_strided_slice %39 {offsets = [0, 0, 0], sizes = [1, 4, 96], strides = [1, 1, 1]} : vector<8x4x96xf32> to vector<1x4x96xf32>
    %43 = vector.shape_cast %42 : vector<1x4x96xf32> to vector<4x96xf32>
    %cst_22 = arith.constant dense<0.000000e+00> : vector<4x96xf32>
    %44 = tpu.matmul %41, %40, %cst_22 {dimension_numbers = #tpu.dot_dimension_numbers<[1], [0], [0], [1], [0, 0, 1, 1], [], []>} : vector<4x32xf32>, vector<32x96xf32>, vector<4x96xf32> -> vector<4x96xf32>
    %45 = vector.broadcast %34 : vector<1x96xf32> to vector<4x96xf32>
    %46 = arith.addf %44, %45 : vector<4x96xf32>
    %47 = vector.extract_strided_slice %43 {offsets = [0, 0], sizes = [4, 64], strides = [1, 1]} : vector<4x96xf32> to vector<4x64xf32>
    %48 = vector.extract_strided_slice %46 {offsets = [0, 0], sizes = [4, 64], strides = [1, 1]} : vector<4x96xf32> to vector<4x64xf32>
    %49 = arith.addf %47, %48 : vector<4x64xf32>
    %50 = arith.negf %49 : vector<4x64xf32>
    %51 = math.exp %50 : vector<4x64xf32>
    %cst_23 = arith.constant 1.000000e+00 : f32
    %52 = vector.broadcast %cst_23 : f32 to vector<4x64xf32>
    %53 = arith.addf %52, %51 : vector<4x64xf32>
    %54 = arith.divf %52, %53 : vector<4x64xf32>
    %55 = vector.extract_strided_slice %54 {offsets = [0, 0], sizes = [4, 32], strides = [1, 1]} : vector<4x64xf32> to vector<4x32xf32>
    %56 = vector.extract_strided_slice %54 {offsets = [0, 32], sizes = [4, 32], strides = [1, 1]} : vector<4x64xf32> to vector<4x32xf32>
    %57 = vector.extract_strided_slice %43 {offsets = [0, 64], sizes = [4, 32], strides = [1, 1]} : vector<4x96xf32> to vector<4x32xf32>
    %58 = vector.extract_strided_slice %46 {offsets = [0, 64], sizes = [4, 32], strides = [1, 1]} : vector<4x96xf32> to vector<4x32xf32>
    %59 = arith.mulf %55, %58 : vector<4x32xf32>
    %60 = arith.addf %57, %59 : vector<4x32xf32>
    %61 = math.tanh %60 : vector<4x32xf32>
    %cst_24 = arith.constant 1.000000e+00 : f32
    %62 = vector.broadcast %cst_24 : f32 to vector<4x32xf32>
    %63 = arith.subf %62, %56 : vector<4x32xf32>
    %64 = arith.mulf %63, %61 : vector<4x32xf32>
    %65 = arith.mulf %56, %41 : vector<4x32xf32>
    %66 = arith.addf %64, %65 : vector<4x32xf32>
    %67 = vector.extract_strided_slice %39 {offsets = [1, 0, 0], sizes = [1, 4, 96], strides = [1, 1, 1]} : vector<8x4x96xf32> to vector<1x4x96xf32>
    %68 = vector.shape_cast %67 : vector<1x4x96xf32> to vector<4x96xf32>
    %cst_25 = arith.constant dense<0.000000e+00> : vector<4x96xf32>
    %69 = tpu.matmul %66, %40, %cst_25 {dimension_numbers = #tpu.dot_dimension_numbers<[1], [0], [0], [1], [0, 0, 1, 1], [], []>} : vector<4x32xf32>, vector<32x96xf32>, vector<4x96xf32> -> vector<4x96xf32>
    %70 = vector.broadcast %34 : vector<1x96xf32> to vector<4x96xf32>
    %71 = arith.addf %69, %70 : vector<4x96xf32>
    %72 = vector.extract_strided_slice %68 {offsets = [0, 0], sizes = [4, 64], strides = [1, 1]} : vector<4x96xf32> to vector<4x64xf32>
    %73 = vector.extract_strided_slice %71 {offsets = [0, 0], sizes = [4, 64], strides = [1, 1]} : vector<4x96xf32> to vector<4x64xf32>
    %74 = arith.addf %72, %73 : vector<4x64xf32>
    %75 = arith.negf %74 : vector<4x64xf32>
    %76 = math.exp %75 : vector<4x64xf32>
    %cst_26 = arith.constant 1.000000e+00 : f32
    %77 = vector.broadcast %cst_26 : f32 to vector<4x64xf32>
    %78 = arith.addf %77, %76 : vector<4x64xf32>
    %79 = arith.divf %77, %78 : vector<4x64xf32>
    %80 = vector.extract_strided_slice %79 {offsets = [0, 0], sizes = [4, 32], strides = [1, 1]} : vector<4x64xf32> to vector<4x32xf32>
    %81 = vector.extract_strided_slice %79 {offsets = [0, 32], sizes = [4, 32], strides = [1, 1]} : vector<4x64xf32> to vector<4x32xf32>
    %82 = vector.extract_strided_slice %68 {offsets = [0, 64], sizes = [4, 32], strides = [1, 1]} : vector<4x96xf32> to vector<4x32xf32>
    %83 = vector.extract_strided_slice %71 {offsets = [0, 64], sizes = [4, 32], strides = [1, 1]} : vector<4x96xf32> to vector<4x32xf32>
    %84 = arith.mulf %80, %83 : vector<4x32xf32>
    %85 = arith.addf %82, %84 : vector<4x32xf32>
    %86 = math.tanh %85 : vector<4x32xf32>
    %cst_27 = arith.constant 1.000000e+00 : f32
    %87 = vector.broadcast %cst_27 : f32 to vector<4x32xf32>
    %88 = arith.subf %87, %81 : vector<4x32xf32>
    %89 = arith.mulf %88, %86 : vector<4x32xf32>
    %90 = arith.mulf %81, %66 : vector<4x32xf32>
    %91 = arith.addf %89, %90 : vector<4x32xf32>
    %92 = vector.extract_strided_slice %39 {offsets = [2, 0, 0], sizes = [1, 4, 96], strides = [1, 1, 1]} : vector<8x4x96xf32> to vector<1x4x96xf32>
    %93 = vector.shape_cast %92 : vector<1x4x96xf32> to vector<4x96xf32>
    %cst_28 = arith.constant dense<0.000000e+00> : vector<4x96xf32>
    %94 = tpu.matmul %91, %40, %cst_28 {dimension_numbers = #tpu.dot_dimension_numbers<[1], [0], [0], [1], [0, 0, 1, 1], [], []>} : vector<4x32xf32>, vector<32x96xf32>, vector<4x96xf32> -> vector<4x96xf32>
    %95 = vector.broadcast %34 : vector<1x96xf32> to vector<4x96xf32>
    %96 = arith.addf %94, %95 : vector<4x96xf32>
    %97 = vector.extract_strided_slice %93 {offsets = [0, 0], sizes = [4, 64], strides = [1, 1]} : vector<4x96xf32> to vector<4x64xf32>
    %98 = vector.extract_strided_slice %96 {offsets = [0, 0], sizes = [4, 64], strides = [1, 1]} : vector<4x96xf32> to vector<4x64xf32>
    %99 = arith.addf %97, %98 : vector<4x64xf32>
    %100 = arith.negf %99 : vector<4x64xf32>
    %101 = math.exp %100 : vector<4x64xf32>
    %cst_29 = arith.constant 1.000000e+00 : f32
    %102 = vector.broadcast %cst_29 : f32 to vector<4x64xf32>
    %103 = arith.addf %102, %101 : vector<4x64xf32>
    %104 = arith.divf %102, %103 : vector<4x64xf32>
    %105 = vector.extract_strided_slice %104 {offsets = [0, 0], sizes = [4, 32], strides = [1, 1]} : vector<4x64xf32> to vector<4x32xf32>
    %106 = vector.extract_strided_slice %104 {offsets = [0, 32], sizes = [4, 32], strides = [1, 1]} : vector<4x64xf32> to vector<4x32xf32>
    %107 = vector.extract_strided_slice %93 {offsets = [0, 64], sizes = [4, 32], strides = [1, 1]} : vector<4x96xf32> to vector<4x32xf32>
    %108 = vector.extract_strided_slice %96 {offsets = [0, 64], sizes = [4, 32], strides = [1, 1]} : vector<4x96xf32> to vector<4x32xf32>
    %109 = arith.mulf %105, %108 : vector<4x32xf32>
    %110 = arith.addf %107, %109 : vector<4x32xf32>
    %111 = math.tanh %110 : vector<4x32xf32>
    %cst_30 = arith.constant 1.000000e+00 : f32
    %112 = vector.broadcast %cst_30 : f32 to vector<4x32xf32>
    %113 = arith.subf %112, %106 : vector<4x32xf32>
    %114 = arith.mulf %113, %111 : vector<4x32xf32>
    %115 = arith.mulf %106, %91 : vector<4x32xf32>
    %116 = arith.addf %114, %115 : vector<4x32xf32>
    %117 = vector.extract_strided_slice %39 {offsets = [3, 0, 0], sizes = [1, 4, 96], strides = [1, 1, 1]} : vector<8x4x96xf32> to vector<1x4x96xf32>
    %118 = vector.shape_cast %117 : vector<1x4x96xf32> to vector<4x96xf32>
    %cst_31 = arith.constant dense<0.000000e+00> : vector<4x96xf32>
    %119 = tpu.matmul %116, %40, %cst_31 {dimension_numbers = #tpu.dot_dimension_numbers<[1], [0], [0], [1], [0, 0, 1, 1], [], []>} : vector<4x32xf32>, vector<32x96xf32>, vector<4x96xf32> -> vector<4x96xf32>
    %120 = vector.broadcast %34 : vector<1x96xf32> to vector<4x96xf32>
    %121 = arith.addf %119, %120 : vector<4x96xf32>
    %122 = vector.extract_strided_slice %118 {offsets = [0, 0], sizes = [4, 64], strides = [1, 1]} : vector<4x96xf32> to vector<4x64xf32>
    %123 = vector.extract_strided_slice %121 {offsets = [0, 0], sizes = [4, 64], strides = [1, 1]} : vector<4x96xf32> to vector<4x64xf32>
    %124 = arith.addf %122, %123 : vector<4x64xf32>
    %125 = arith.negf %124 : vector<4x64xf32>
    %126 = math.exp %125 : vector<4x64xf32>
    %cst_32 = arith.constant 1.000000e+00 : f32
    %127 = vector.broadcast %cst_32 : f32 to vector<4x64xf32>
    %128 = arith.addf %127, %126 : vector<4x64xf32>
    %129 = arith.divf %127, %128 : vector<4x64xf32>
    %130 = vector.extract_strided_slice %129 {offsets = [0, 0], sizes = [4, 32], strides = [1, 1]} : vector<4x64xf32> to vector<4x32xf32>
    %131 = vector.extract_strided_slice %129 {offsets = [0, 32], sizes = [4, 32], strides = [1, 1]} : vector<4x64xf32> to vector<4x32xf32>
    %132 = vector.extract_strided_slice %118 {offsets = [0, 64], sizes = [4, 32], strides = [1, 1]} : vector<4x96xf32> to vector<4x32xf32>
    %133 = vector.extract_strided_slice %121 {offsets = [0, 64], sizes = [4, 32], strides = [1, 1]} : vector<4x96xf32> to vector<4x32xf32>
    %134 = arith.mulf %130, %133 : vector<4x32xf32>
    %135 = arith.addf %132, %134 : vector<4x32xf32>
    %136 = math.tanh %135 : vector<4x32xf32>
    %cst_33 = arith.constant 1.000000e+00 : f32
    %137 = vector.broadcast %cst_33 : f32 to vector<4x32xf32>
    %138 = arith.subf %137, %131 : vector<4x32xf32>
    %139 = arith.mulf %138, %136 : vector<4x32xf32>
    %140 = arith.mulf %131, %116 : vector<4x32xf32>
    %141 = arith.addf %139, %140 : vector<4x32xf32>
    %142 = vector.extract_strided_slice %39 {offsets = [4, 0, 0], sizes = [1, 4, 96], strides = [1, 1, 1]} : vector<8x4x96xf32> to vector<1x4x96xf32>
    %143 = vector.shape_cast %142 : vector<1x4x96xf32> to vector<4x96xf32>
    %cst_34 = arith.constant dense<0.000000e+00> : vector<4x96xf32>
    %144 = tpu.matmul %141, %40, %cst_34 {dimension_numbers = #tpu.dot_dimension_numbers<[1], [0], [0], [1], [0, 0, 1, 1], [], []>} : vector<4x32xf32>, vector<32x96xf32>, vector<4x96xf32> -> vector<4x96xf32>
    %145 = vector.broadcast %34 : vector<1x96xf32> to vector<4x96xf32>
    %146 = arith.addf %144, %145 : vector<4x96xf32>
    %147 = vector.extract_strided_slice %143 {offsets = [0, 0], sizes = [4, 64], strides = [1, 1]} : vector<4x96xf32> to vector<4x64xf32>
    %148 = vector.extract_strided_slice %146 {offsets = [0, 0], sizes = [4, 64], strides = [1, 1]} : vector<4x96xf32> to vector<4x64xf32>
    %149 = arith.addf %147, %148 : vector<4x64xf32>
    %150 = arith.negf %149 : vector<4x64xf32>
    %151 = math.exp %150 : vector<4x64xf32>
    %cst_35 = arith.constant 1.000000e+00 : f32
    %152 = vector.broadcast %cst_35 : f32 to vector<4x64xf32>
    %153 = arith.addf %152, %151 : vector<4x64xf32>
    %154 = arith.divf %152, %153 : vector<4x64xf32>
    %155 = vector.extract_strided_slice %154 {offsets = [0, 0], sizes = [4, 32], strides = [1, 1]} : vector<4x64xf32> to vector<4x32xf32>
    %156 = vector.extract_strided_slice %154 {offsets = [0, 32], sizes = [4, 32], strides = [1, 1]} : vector<4x64xf32> to vector<4x32xf32>
    %157 = vector.extract_strided_slice %143 {offsets = [0, 64], sizes = [4, 32], strides = [1, 1]} : vector<4x96xf32> to vector<4x32xf32>
    %158 = vector.extract_strided_slice %146 {offsets = [0, 64], sizes = [4, 32], strides = [1, 1]} : vector<4x96xf32> to vector<4x32xf32>
    %159 = arith.mulf %155, %158 : vector<4x32xf32>
    %160 = arith.addf %157, %159 : vector<4x32xf32>
    %161 = math.tanh %160 : vector<4x32xf32>
    %cst_36 = arith.constant 1.000000e+00 : f32
    %162 = vector.broadcast %cst_36 : f32 to vector<4x32xf32>
    %163 = arith.subf %162, %156 : vector<4x32xf32>
    %164 = arith.mulf %163, %161 : vector<4x32xf32>
    %165 = arith.mulf %156, %141 : vector<4x32xf32>
    %166 = arith.addf %164, %165 : vector<4x32xf32>
    %167 = vector.extract_strided_slice %39 {offsets = [5, 0, 0], sizes = [1, 4, 96], strides = [1, 1, 1]} : vector<8x4x96xf32> to vector<1x4x96xf32>
    %168 = vector.shape_cast %167 : vector<1x4x96xf32> to vector<4x96xf32>
    %cst_37 = arith.constant dense<0.000000e+00> : vector<4x96xf32>
    %169 = tpu.matmul %166, %40, %cst_37 {dimension_numbers = #tpu.dot_dimension_numbers<[1], [0], [0], [1], [0, 0, 1, 1], [], []>} : vector<4x32xf32>, vector<32x96xf32>, vector<4x96xf32> -> vector<4x96xf32>
    %170 = vector.broadcast %34 : vector<1x96xf32> to vector<4x96xf32>
    %171 = arith.addf %169, %170 : vector<4x96xf32>
    %172 = vector.extract_strided_slice %168 {offsets = [0, 0], sizes = [4, 64], strides = [1, 1]} : vector<4x96xf32> to vector<4x64xf32>
    %173 = vector.extract_strided_slice %171 {offsets = [0, 0], sizes = [4, 64], strides = [1, 1]} : vector<4x96xf32> to vector<4x64xf32>
    %174 = arith.addf %172, %173 : vector<4x64xf32>
    %175 = arith.negf %174 : vector<4x64xf32>
    %176 = math.exp %175 : vector<4x64xf32>
    %cst_38 = arith.constant 1.000000e+00 : f32
    %177 = vector.broadcast %cst_38 : f32 to vector<4x64xf32>
    %178 = arith.addf %177, %176 : vector<4x64xf32>
    %179 = arith.divf %177, %178 : vector<4x64xf32>
    %180 = vector.extract_strided_slice %179 {offsets = [0, 0], sizes = [4, 32], strides = [1, 1]} : vector<4x64xf32> to vector<4x32xf32>
    %181 = vector.extract_strided_slice %179 {offsets = [0, 32], sizes = [4, 32], strides = [1, 1]} : vector<4x64xf32> to vector<4x32xf32>
    %182 = vector.extract_strided_slice %168 {offsets = [0, 64], sizes = [4, 32], strides = [1, 1]} : vector<4x96xf32> to vector<4x32xf32>
    %183 = vector.extract_strided_slice %171 {offsets = [0, 64], sizes = [4, 32], strides = [1, 1]} : vector<4x96xf32> to vector<4x32xf32>
    %184 = arith.mulf %180, %183 : vector<4x32xf32>
    %185 = arith.addf %182, %184 : vector<4x32xf32>
    %186 = math.tanh %185 : vector<4x32xf32>
    %cst_39 = arith.constant 1.000000e+00 : f32
    %187 = vector.broadcast %cst_39 : f32 to vector<4x32xf32>
    %188 = arith.subf %187, %181 : vector<4x32xf32>
    %189 = arith.mulf %188, %186 : vector<4x32xf32>
    %190 = arith.mulf %181, %166 : vector<4x32xf32>
    %191 = arith.addf %189, %190 : vector<4x32xf32>
    %192 = vector.extract_strided_slice %39 {offsets = [6, 0, 0], sizes = [1, 4, 96], strides = [1, 1, 1]} : vector<8x4x96xf32> to vector<1x4x96xf32>
    %193 = vector.shape_cast %192 : vector<1x4x96xf32> to vector<4x96xf32>
    %cst_40 = arith.constant dense<0.000000e+00> : vector<4x96xf32>
    %194 = tpu.matmul %191, %40, %cst_40 {dimension_numbers = #tpu.dot_dimension_numbers<[1], [0], [0], [1], [0, 0, 1, 1], [], []>} : vector<4x32xf32>, vector<32x96xf32>, vector<4x96xf32> -> vector<4x96xf32>
    %195 = vector.broadcast %34 : vector<1x96xf32> to vector<4x96xf32>
    %196 = arith.addf %194, %195 : vector<4x96xf32>
    %197 = vector.extract_strided_slice %193 {offsets = [0, 0], sizes = [4, 64], strides = [1, 1]} : vector<4x96xf32> to vector<4x64xf32>
    %198 = vector.extract_strided_slice %196 {offsets = [0, 0], sizes = [4, 64], strides = [1, 1]} : vector<4x96xf32> to vector<4x64xf32>
    %199 = arith.addf %197, %198 : vector<4x64xf32>
    %200 = arith.negf %199 : vector<4x64xf32>
    %201 = math.exp %200 : vector<4x64xf32>
    %cst_41 = arith.constant 1.000000e+00 : f32
    %202 = vector.broadcast %cst_41 : f32 to vector<4x64xf32>
    %203 = arith.addf %202, %201 : vector<4x64xf32>
    %204 = arith.divf %202, %203 : vector<4x64xf32>
    %205 = vector.extract_strided_slice %204 {offsets = [0, 0], sizes = [4, 32], strides = [1, 1]} : vector<4x64xf32> to vector<4x32xf32>
    %206 = vector.extract_strided_slice %204 {offsets = [0, 32], sizes = [4, 32], strides = [1, 1]} : vector<4x64xf32> to vector<4x32xf32>
    %207 = vector.extract_strided_slice %193 {offsets = [0, 64], sizes = [4, 32], strides = [1, 1]} : vector<4x96xf32> to vector<4x32xf32>
    %208 = vector.extract_strided_slice %196 {offsets = [0, 64], sizes = [4, 32], strides = [1, 1]} : vector<4x96xf32> to vector<4x32xf32>
    %209 = arith.mulf %205, %208 : vector<4x32xf32>
    %210 = arith.addf %207, %209 : vector<4x32xf32>
    %211 = math.tanh %210 : vector<4x32xf32>
    %cst_42 = arith.constant 1.000000e+00 : f32
    %212 = vector.broadcast %cst_42 : f32 to vector<4x32xf32>
    %213 = arith.subf %212, %206 : vector<4x32xf32>
    %214 = arith.mulf %213, %211 : vector<4x32xf32>
    %215 = arith.mulf %206, %191 : vector<4x32xf32>
    %216 = arith.addf %214, %215 : vector<4x32xf32>
    %217 = vector.extract_strided_slice %39 {offsets = [7, 0, 0], sizes = [1, 4, 96], strides = [1, 1, 1]} : vector<8x4x96xf32> to vector<1x4x96xf32>
    %218 = vector.shape_cast %217 : vector<1x4x96xf32> to vector<4x96xf32>
    %cst_43 = arith.constant dense<0.000000e+00> : vector<4x96xf32>
    %219 = tpu.matmul %216, %40, %cst_43 {dimension_numbers = #tpu.dot_dimension_numbers<[1], [0], [0], [1], [0, 0, 1, 1], [], []>} : vector<4x32xf32>, vector<32x96xf32>, vector<4x96xf32> -> vector<4x96xf32>
    %220 = vector.broadcast %34 : vector<1x96xf32> to vector<4x96xf32>
    %221 = arith.addf %219, %220 : vector<4x96xf32>
    %222 = vector.extract_strided_slice %218 {offsets = [0, 0], sizes = [4, 64], strides = [1, 1]} : vector<4x96xf32> to vector<4x64xf32>
    %223 = vector.extract_strided_slice %221 {offsets = [0, 0], sizes = [4, 64], strides = [1, 1]} : vector<4x96xf32> to vector<4x64xf32>
    %224 = arith.addf %222, %223 : vector<4x64xf32>
    %225 = arith.negf %224 : vector<4x64xf32>
    %226 = math.exp %225 : vector<4x64xf32>
    %cst_44 = arith.constant 1.000000e+00 : f32
    %227 = vector.broadcast %cst_44 : f32 to vector<4x64xf32>
    %228 = arith.addf %227, %226 : vector<4x64xf32>
    %229 = arith.divf %227, %228 : vector<4x64xf32>
    %230 = vector.extract_strided_slice %229 {offsets = [0, 0], sizes = [4, 32], strides = [1, 1]} : vector<4x64xf32> to vector<4x32xf32>
    %231 = vector.extract_strided_slice %229 {offsets = [0, 32], sizes = [4, 32], strides = [1, 1]} : vector<4x64xf32> to vector<4x32xf32>
    %232 = vector.extract_strided_slice %218 {offsets = [0, 64], sizes = [4, 32], strides = [1, 1]} : vector<4x96xf32> to vector<4x32xf32>
    %233 = vector.extract_strided_slice %221 {offsets = [0, 64], sizes = [4, 32], strides = [1, 1]} : vector<4x96xf32> to vector<4x32xf32>
    %234 = arith.mulf %230, %233 : vector<4x32xf32>
    %235 = arith.addf %232, %234 : vector<4x32xf32>
    %236 = math.tanh %235 : vector<4x32xf32>
    %cst_45 = arith.constant 1.000000e+00 : f32
    %237 = vector.broadcast %cst_45 : f32 to vector<4x32xf32>
    %238 = arith.subf %237, %231 : vector<4x32xf32>
    %239 = arith.mulf %238, %236 : vector<4x32xf32>
    %240 = arith.mulf %231, %216 : vector<4x32xf32>
    %241 = arith.addf %239, %240 : vector<4x32xf32>
    %242 = vector.shape_cast %66 : vector<4x32xf32> to vector<1x4x32xf32>
    %243 = vector.shape_cast %91 : vector<4x32xf32> to vector<1x4x32xf32>
    %244 = vector.shape_cast %116 : vector<4x32xf32> to vector<1x4x32xf32>
    %245 = vector.shape_cast %141 : vector<4x32xf32> to vector<1x4x32xf32>
    %246 = vector.shape_cast %166 : vector<4x32xf32> to vector<1x4x32xf32>
    %247 = vector.shape_cast %191 : vector<4x32xf32> to vector<1x4x32xf32>
    %248 = vector.shape_cast %216 : vector<4x32xf32> to vector<1x4x32xf32>
    %249 = vector.shape_cast %241 : vector<4x32xf32> to vector<1x4x32xf32>
    %250 = tpu.concatenate %242, %243, %244, %245, %246, %247, %248, %249 in 0 : vector<1x4x32xf32>, vector<1x4x32xf32>, vector<1x4x32xf32>, vector<1x4x32xf32>, vector<1x4x32xf32>, vector<1x4x32xf32>, vector<1x4x32xf32>, vector<1x4x32xf32> -> vector<8x4x32xf32>
    %251 = vector.shape_cast %250 : vector<8x4x32xf32> to vector<32x32xf32>
    %c0_46 = arith.constant 0 : index
    %c0_47 = arith.constant 0 : index
    %252 = vector.load %arg7[%c0_46, %c0_47] : memref<32x32xf32, #tpu.memory_space<vmem>>, vector<32x32xf32>
    %cst_48 = arith.constant dense<0.000000e+00> : vector<32x32xf32>
    %253 = tpu.matmul %251, %252, %cst_48 {dimension_numbers = #tpu.dot_dimension_numbers<[1], [0], [0], [1], [0, 0, 1, 1], [], []>} : vector<32x32xf32>, vector<32x32xf32>, vector<32x32xf32> -> vector<32x32xf32>
    %c0_49 = arith.constant 0 : index
    %c0_50 = arith.constant 0 : index
    %254 = vector.load %arg8[%c0_49, %c0_50] : memref<1x32xf32, #tpu.memory_space<vmem>>, vector<1x32xf32>
    %255 = vector.broadcast %254 : vector<1x32xf32> to vector<32x32xf32>
    %256 = arith.addf %253, %255 : vector<32x32xf32>
    %257 = vector.extract_strided_slice %0 {offsets = [0, 2], sizes = [32, 1], strides = [1, 1]} : vector<32x4xf32> to vector<32x1xf32>
    %258 = vector.extract_strided_slice %0 {offsets = [0, 3], sizes = [32, 1], strides = [1, 1]} : vector<32x4xf32> to vector<32x1xf32>
    %cst_51 = arith.constant dense<0.000000e+00> : vector<32xf32>
    %259 = vector.multi_reduction <add>, %256, %cst_51 [1] : vector<32x32xf32> to vector<32xf32>
    %260 = vector.shape_cast %259 : vector<32xf32> to vector<32x1xf32>
    %cst_52 = arith.constant 3.125000e-02 : f32
    %261 = vector.broadcast %cst_52 : f32 to vector<32x1xf32>
    %262 = arith.mulf %260, %261 : vector<32x1xf32>
    %263 = arith.mulf %256, %256 : vector<32x32xf32>
    %cst_53 = arith.constant dense<0.000000e+00> : vector<32xf32>
    %264 = vector.multi_reduction <add>, %263, %cst_53 [1] : vector<32x32xf32> to vector<32xf32>
    %265 = vector.shape_cast %264 : vector<32xf32> to vector<32x1xf32>
    %cst_54 = arith.constant 3.125000e-02 : f32
    %266 = vector.broadcast %cst_54 : f32 to vector<32x1xf32>
    %267 = arith.mulf %265, %266 : vector<32x1xf32>
    %268 = arith.mulf %262, %262 : vector<32x1xf32>
    %269 = arith.subf %267, %268 : vector<32x1xf32>
    %cst_55 = arith.constant 0.000000e+00 : f32
    %270 = vector.broadcast %cst_55 : f32 to vector<32x1xf32>
    %271 = arith.maximumf %269, %270 : vector<32x1xf32>
    %272 = vector.broadcast %262 : vector<32x1xf32> to vector<32x32xf32>
    %273 = arith.subf %256, %272 : vector<32x32xf32>
    %cst_56 = arith.constant 9.99999974E-6 : f32
    %274 = vector.broadcast %cst_56 : f32 to vector<32x1xf32>
    %275 = arith.addf %271, %274 : vector<32x1xf32>
    %276 = math.rsqrt %275 : vector<32x1xf32>
    %277 = vector.broadcast %276 : vector<32x1xf32> to vector<32x32xf32>
    %278 = arith.mulf %273, %277 : vector<32x32xf32>
    %279 = vector.broadcast %257 : vector<32x1xf32> to vector<32x32xf32>
    %280 = arith.mulf %278, %279 : vector<32x32xf32>
    %281 = vector.broadcast %258 : vector<32x1xf32> to vector<32x32xf32>
    %282 = arith.addf %280, %281 : vector<32x32xf32>
    %283 = math.tanh %282 : vector<32x32xf32>
    %c0_57 = arith.constant 0 : index
    %c0_58 = arith.constant 0 : index
    %284 = vector.load %arg9[%c0_57, %c0_58] : memref<32x16xf32, #tpu.memory_space<vmem>>, vector<32x16xf32>
    %cst_59 = arith.constant dense<0.000000e+00> : vector<32x16xf32>
    %285 = tpu.matmul %283, %284, %cst_59 {dimension_numbers = #tpu.dot_dimension_numbers<[1], [0], [0], [1], [0, 0, 1, 1], [], []>} : vector<32x32xf32>, vector<32x16xf32>, vector<32x16xf32> -> vector<32x16xf32>
    %c0_60 = arith.constant 0 : index
    %c0_61 = arith.constant 0 : index
    %286 = vector.load %arg10[%c0_60, %c0_61] : memref<1x16xf32, #tpu.memory_space<vmem>>, vector<1x16xf32>
    %287 = vector.broadcast %286 : vector<1x16xf32> to vector<32x16xf32>
    %288 = arith.addf %285, %287 : vector<32x16xf32>
    %289 = arith.negf %288 : vector<32x16xf32>
    %290 = math.exp %289 : vector<32x16xf32>
    %cst_62 = arith.constant 1.000000e+00 : f32
    %291 = vector.broadcast %cst_62 : f32 to vector<32x16xf32>
    %292 = arith.addf %291, %290 : vector<32x16xf32>
    %293 = arith.divf %291, %292 : vector<32x16xf32>
    %c0_63 = arith.constant 0 : index
    %c0_64 = arith.constant 0 : index
    %294 = vector.load %arg12[%c0_63, %c0_64] : memref<32x1xf32, #tpu.memory_space<vmem>>, vector<32x1xf32>
    %c0_65 = arith.constant 0 : index
    %c0_66 = arith.constant 0 : index
    %295 = vector.load %arg11[%c0_65, %c0_66] : memref<32x16xf32, #tpu.memory_space<vmem>>, vector<32x16xf32>
    %296 = arith.subf %293, %295 : vector<32x16xf32>
    %297 = vector.broadcast %294 : vector<32x1xf32> to vector<32x16xf32>
    %298 = arith.mulf %297, %296 : vector<32x16xf32>
    %c0_67 = arith.constant 0 : index
    %c0_68 = arith.constant 0 : index
    %299 = vector.load %arg13[%c0_67, %c0_68] : memref<32x16xf32, #tpu.memory_space<vmem>>, vector<32x16xf32>
    %300 = arith.mulf %298, %299 : vector<32x16xf32>
    %c0_69 = arith.constant 0 : index
    %c0_70 = arith.constant 0 : index
    %301 = vector.load %arg14[%c0_69, %c0_70] : memref<16x512xf32, #tpu.memory_space<vmem>>, vector<16x512xf32>
    %cst_71 = arith.constant dense<0.000000e+00> : vector<32x512xf32>
    %302 = tpu.matmul %300, %301, %cst_71 {dimension_numbers = #tpu.dot_dimension_numbers<[1], [0], [0], [1], [0, 0, 1, 1], [], []>} : vector<32x16xf32>, vector<16x512xf32>, vector<32x512xf32> -> vector<32x512xf32>
    %c0_72 = arith.constant 0 : index
    %c0_73 = arith.constant 0 : index
    %303 = vector.load %arg15[%c0_72, %c0_73] : memref<1x512xf32, #tpu.memory_space<vmem>>, vector<1x512xf32>
    %304 = vector.broadcast %303 : vector<1x512xf32> to vector<32x512xf32>
    %305 = arith.addf %302, %304 : vector<32x512xf32>
    %306 = math.tanh %305 : vector<32x512xf32>
    %c0_74 = arith.constant 0 : index
    %c0_75 = arith.constant 0 : index
    %307 = vector.load %arg16[%c0_74, %c0_75] : memref<512x256xf32, #tpu.memory_space<vmem>>, vector<512x256xf32>
    %cst_76 = arith.constant dense<0.000000e+00> : vector<32x256xf32>
    %308 = tpu.matmul %306, %307, %cst_76 {dimension_numbers = #tpu.dot_dimension_numbers<[1], [0], [0], [1], [0, 0, 1, 1], [], []>} : vector<32x512xf32>, vector<512x256xf32>, vector<32x256xf32> -> vector<32x256xf32>
    %c0_77 = arith.constant 0 : index
    %c0_78 = arith.constant 0 : index
    %309 = vector.load %arg17[%c0_77, %c0_78] : memref<1x256xf32, #tpu.memory_space<vmem>>, vector<1x256xf32>
    %310 = vector.broadcast %309 : vector<1x256xf32> to vector<32x256xf32>
    %311 = arith.addf %308, %310 : vector<32x256xf32>
    %312 = math.tanh %311 : vector<32x256xf32>
    %c0_79 = arith.constant 0 : index
    %c0_80 = arith.constant 0 : index
    %313 = vector.load %arg18[%c0_79, %c0_80] : memref<256x2xf32, #tpu.memory_space<vmem>>, vector<256x2xf32>
    %cst_81 = arith.constant dense<0.000000e+00> : vector<32x2xf32>
    %314 = tpu.matmul %312, %313, %cst_81 {dimension_numbers = #tpu.dot_dimension_numbers<[1], [0], [0], [1], [0, 0, 1, 1], [], []>} : vector<32x256xf32>, vector<256x2xf32>, vector<32x2xf32> -> vector<32x2xf32>
    %c0_82 = arith.constant 0 : index
    %c0_83 = arith.constant 0 : index
    %315 = vector.load %arg19[%c0_82, %c0_83] : memref<1x2xf32, #tpu.memory_space<vmem>>, vector<1x2xf32>
    %316 = vector.broadcast %315 : vector<1x2xf32> to vector<32x2xf32>
    %317 = arith.addf %314, %316 : vector<32x2xf32>
    %318 = arith.negf %317 : vector<32x2xf32>
    %319 = math.exp %318 : vector<32x2xf32>
    %cst_84 = arith.constant 1.000000e+00 : f32
    %320 = vector.broadcast %cst_84 : f32 to vector<32x2xf32>
    %321 = arith.addf %320, %319 : vector<32x2xf32>
    %322 = arith.divf %320, %321 : vector<32x2xf32>
    %c0_85 = arith.constant 0 : index
    %c0_86 = arith.constant 0 : index
    %323 = vector.load %arg20[%c0_85, %c0_86] : memref<32x2xf32, #tpu.memory_space<vmem>>, vector<32x2xf32>
    tpu.vector_store %arg20[%c0_85, %c0_86], %322 {strides = array<i32>} : memref<32x2xf32, #tpu.memory_space<vmem>>, vector<32x2xf32>,
    return
  }
}

</mosaic_0001>

<bundles_post_ra>
// kernel: model_forward.1
= control target key start
LH: loop header
LB: loop body
LE: loop exit
PB: predicated region body
PF: predicated region fallthrough
CT: control target
= control target key end

     0   :  { %vm84_vm0 = vcmask 261120   ;;  %v3094_v10 = vmov 0   ;;  %v3095_v34 = vmov 1   ;;  %v3096_v43 = vmov 0.0|0.0   ;;  %s4189_s1 = inlined_call_operand.vmem [shape: f32[32,32], index: 1, kind: input, shape index: {}]   ;;  %s4190_s0 = inlined_call_operand.vmem [shape: f32[32,32], index: 0, kind: input, shape index: {}]   ;;  %s4191_s2 = inlined_call_operand.vmem [shape: f32[1,32], index: 2, kind: input, shape index: {}]   ;;  %s4192_s3 = inlined_call_operand.vmem [shape: f32[32,4], index: 3, kind: input, shape index: {}]   ;;  %s4193_s4 = inlined_call_operand.vmem [shape: f32[32,96], index: 4, kind: input, shape index: {}]   ;;  %s4194_s5 = inlined_call_operand.vmem [shape: f32[32,96], index: 5, kind: input, shape index: {}]   ;;  %s4195_s6 = inlined_call_operand.vmem [shape: f32[2,96], index: 6, kind: input, shape index: {}]   ;;  %s4196_s7 = inlined_call_operand.vmem [shape: f32[32,32], index: 7, kind: input, shape index: {}]   ;;  %s4197_s8 = inlined_call_operand.vmem [shape: f32[1,32], index: 8, kind: input, shape index: {}]   ;;  %s4198_s9 = inlined_call_operand.vmem [shape: f32[32,16], index: 9, kind: input, shape index: {}]   ;;  %s4199_s12 = inlined_call_operand.vmem [shape: f32[32,1], index: 12, kind: input, shape index: {}]   ;;  %s4200_s14 = inlined_call_operand.vmem [shape: f32[16,512], index: 14, kind: input, shape index: {}]   ;;  %s4201_s16 = inlined_call_operand.vmem [shape: f32[512,256], index: 16, kind: input, shape index: {}]   ;;  %s4202_s10 = inlined_call_operand.vmem [shape: f32[1,16], index: 10, kind: input, shape index: {}]   ;;  %s4203_s11 = inlined_call_operand.vmem [shape: f32[32,16], index: 11, kind: input, shape index: {}]   ;;  %s4204_s13 = inlined_call_operand.vmem [shape: f32[32,16], index: 13, kind: input, shape index: {}]   ;;  %s4205_s18 = inlined_call_operand.vmem [shape: f32[256,2], index: 18, kind: input, shape index: {}]   ;;  %s4206_s15 = inlined_call_operand.vmem [shape: f32[1,512], index: 15, kind: input, shape index: {}]   ;;  %s4207_s17 = inlined_call_operand.vmem [shape: f32[1,256], index: 17, kind: input, shape index: {}]   ;;  %s4208_s19 = inlined_call_operand.vmem [shape: f32[1,2], index: 19, kind: input, shape index: {}]   ;;  %s4209_s20 = inlined_call_operand.vmem [shape: f32[32,2], index: 20, kind: output, shape index: {}]  }
   0x1   :  { %4214 = sst [smem:[#allocation2_spill]] %s4189_s1  ;;  %2931 = vset.pattern.permute.xlu1 %v3094_v10  ;;  %2930 = vset.pattern.permute.xlu0 %v3094_v10  ;;  %v409_v44 = vld [vmem:[%s4194_s5] sm:$0xff]  ;;  %v410_v45 = vld [vmem:[%s4194_s5 + $0x8] sm:$0xff]  ;;  %v411_v47 = vld [vmem:[%s4194_s5 + $0x10] sm:$0xff]  ;;  %vm3097_vm1 = vmmov 0   ;;  %v3098_v50 = vmov 0.0  }
   0x2   :  { %4215 = sst [smem:[#allocation3_spill]] %s4190_s0  ;;  %s4219_s23 = sld [smem:[#allocation2_spill]]  ;;  %2679 = vmatprep.subr.bf16.mxu1 %v3096_v43  ;;  %v3317_v46 = vpack.c.bf16 %v410_v45, %v409_v44  ;;  %v412_v48 = vld [vmem:[%s4194_s5 + $0x18] sm:$0xff]  ;;  %2560 = vmatprep.mubr.msk.f32.mxu1 %vm3097_vm1, %v3098_v50  ;;  %vm1654_vm2 = vcmask 130048   ;;  %vm2335_vm3 = vcmask 15360  }
   0x3   :  { %4216 = sst [smem:[#allocation4_spill]] %s4191_s2  ;;  %s4220_s29 = sld [smem:[#allocation3_spill]]  ;;  %v3328_v49 = vpack.c.bf16 %v412_v48, %v411_v47 }
   0x4   :  { %4217 = sst [smem:[#allocation5_spill]] %s4192_s3  ;;  %s4221_s25 = sld [smem:[#allocation4_spill]]  ;;  %2681 = vmatpush3.bf16.msra.mxu1 %v3317_v46 }
   0x5   :  { %4218 = sst [smem:[#allocation6_spill]] %s4193_s4  ;;  %s4222_s27 = sld [smem:[#allocation5_spill]]  ;;  %2682 = vmatprep.subr.bf16.mxu1 %v3096_v43 }
   0x6   :  { %s4223_s1 = sld [smem:[#allocation6_spill]] }
   0x8   :  { %v73_v0 = vld [vmem:[%s4219_s23] sm:$0xff]  ;;  %v74_v1 = vld [vmem:[%s4219_s23 + $0x8] sm:$0xff]  ;;  %v75_v2 = vld [vmem:[%s4219_s23 + $0x10] sm:$0xff]  ;;  %2684 = vmatpush3.bf16.msra.mxu1 %v3328_v49 }
   0x9   :  { %v2657_v3 = vpack.c.bf16 %v74_v1, %v73_v0  ;;  %v76_v4 = vld [vmem:[%s4219_s23 + $0x18] sm:$0xff]  ;;  %v69_v5 = vld [vmem:[%s4220_s29] sm:$0xff]  ;;  %v70_v7 = vld [vmem:[%s4220_s29 + $0x8] sm:$0xff]  ;;  %2691 = vmatprep.subr.bf16.mxu1 %v3096_v43 }
   0xa   :  { %v2661_v6 = vpack.c.bf16 %v76_v4, %v75_v2  ;;  %2521 = vmatprep.mubr.msk.f32.mxu0 %vm84_vm0, %v69_v5  ;;  %v71_v8 = vld [vmem:[%s4220_s29 + $0x10] sm:$0xff]  ;;  %v72_v9 = vld [vmem:[%s4220_s29 + $0x18] sm:$0xff]  ;;  %v2344_v11 = vld [vmem:[%s4221_s25] ss:$0 sm:$0xff]  ;;  %s3099_s25 = smov 64  }
   0xb   :  { %2658 = vmatprep.subr.bf16.mxu0 %v2657_v3  ;;  %v3272_v32 = vld [vmem:[%s4222_s27 + $0x8] sm:$0xff]  ;;  %v3278_v33 = vld [vmem:[%s4222_s27] sm:$0xff]  ;;  %v3298_v41 = vld [vmem:[%s4222_s27 + $0x10] sm:$0xff] }
   0xc   :  { %2660 = vmatpush3.bf16.msra.mxu0 %v2657_v3  ;;  %v292_v35 = vld [vmem:[%s4223_s1] sm:$0xff]  ;;  %v293_v36 = vld [vmem:[%s4223_s1 + $0x8] sm:$0xff]  ;;  %v294_v38 = vld [vmem:[%s4223_s1 + $0x10] sm:$0xff] }
   0xd   :  { %2662 = vmatprep.subr.bf16.mxu0 %v2661_v6  ;;  %v2665_v37 = vpack.c.bf16 %v293_v36, %v292_v35  ;;  %v295_v39 = vld [vmem:[%s4223_s1 + $0x18] sm:$0xff] }
   0xe   :  { %v2669_v40 = vpack.c.bf16 %v295_v39, %v294_v38  ;;  %v3305_v42 = vld [vmem:[%s4222_s27 + $0x18] sm:$0xff] }
  0x10   :  { %2664 = vmatpush3.bf16.msra.mxu0 %v2661_v6 }
  0x11   :  { %2666 = vmatprep.subr.bf16.mxu0 %v2665_v37 }
  0x13   :  { %2522 = vmatmul.mubr.msk.f32.vlgmr.msra.gmra.mrb[0].mxu0 %vm84_vm0, %v70_v7 }
  0x14   :  { %2524 = vmatprep.mubr.msk.f32.mxu0 %vm84_vm0, %v71_v8  ;;  %2668 = vmatpush3.bf16.msra.mxu0 %v2665_v37 }
  0x15   :  { %2670 = vmatprep.subr.bf16.mxu0 %v2669_v40 }
  0x17   :  { %2525 = vmatmul.mubr.msk.f32.gmra.mrb[2].mxu0 %vm84_vm0, %v72_v9 }
  0x18   :  { %2672 = vmatpush3.bf16.msra.mxu0 %v2669_v40 }
  0x19   :  { %2673 = vmatprep.subr.bf16.mxu0 %v3096_v43 }
  0xe6   :  { %v2523_v12 = vpop.f32.mrb[0].mxu0 }
  0xe7   :  { %v3241_v13 = vadd.f32 %v2523_v12, %v2344_v11  ;;  %v163_v14 = vpop.f32.mrb[1].mxu0 }
  0xe8   :  { %v3243_v15 = vadd.f32 %v2344_v11, %v163_v14 }
  0xe9   :  { %v185_v16 = vsel %vm84_vm0, %v3241_v13, 0.0  ;;  %v199_v17 = vmul.f32 %v3241_v13, %v3241_v13 }
  0xea   :  { %186 = vadd.xlane.f32.xlu0 %v185_v16  ;;  %v2526_v18 = vpop.f32.mrb[2].mxu0  ;;  %v198_v21 = vmul.f32 %v3243_v15, %v3243_v15  ;;  %v182_v24 = vsel %vm84_vm0, %v3243_v15, 0.0 }
  0xeb   :  { %v205_v19 = vsel %vm84_vm0, %v199_v17, 0.0  ;;  %v173_v20 = vpop.f32.mrb[3].mxu0  ;;  %v3254_v23 = vadd.f32 %v2526_v18, %v2344_v11 }
  0xec   :  { %206 = vadd.xlane.f32.xlu1 %v205_v19  ;;  %v3252_v22 = vadd.f32 %v2344_v11, %v173_v20  ;;  %v202_v25 = vsel %vm84_vm0, %v198_v21, 0.0 }
  0xed   :  { %v191_v28 = vsel %vm84_vm0, %v3254_v23, 0.0  ;;  %v201_v30 = vmul.f32 %v3254_v23, %v3254_v23 }
  0xee   :  { %183 = vadd.xlane.f32.xlu0 %v182_v24  ;;  %v188_v26 = vsel %vm84_vm0, %v3252_v22, 0.0  ;;  %v200_v27 = vmul.f32 %v3252_v22, %v3252_v22 }
  0xef   :  { %v211_v31 = vsel %vm84_vm0, %v201_v30, 0.0 }
  0xf0   :  { %203 = vadd.xlane.f32.xlu1 %v202_v25  ;;  %v208_v29 = vsel %vm84_vm0, %v200_v27, 0.0 }
  0xf2   :  { %189 = vadd.xlane.f32.xlu0 %v188_v26 }
  0xf4   :  { %192 = vadd.xlane.f32.xlu1 %v191_v28 }
  0xf6   :  { %209 = vadd.xlane.f32.xlu0 %v208_v29 }
  0xf8   :  { %212 = vadd.xlane.f32.xlu1 %v211_v31 }
 0x109   :  { %253 = vperm.xlu1 %2931, %v3272_v32  }
 0x10c   :  { %248 = vperm.xlu0 %2930, %v3278_v33  }
 0x10d   :  { %2932 = vset.pattern.permute.xlu1 %v3095_v34 }
 0x10e   :  { %271 = vperm.xlu1 %2932, %v3278_v33  }
 0x112   :  { %275 = vperm.xlu1 %2932, %v3272_v32  }
 0x116   :  { %2933 = vset.pattern.permute.xlu1 %v3094_v10 }
 0x117   :  { %258 = vperm.xlu1 %2933, %v3298_v41  }
 0x11b   :  { %263 = vperm.xlu1 %2933, %v3305_v42  }
 0x11f   :  { %2934 = vset.pattern.permute.xlu1 %v3095_v34 }
 0x120   :  { %279 = vperm.xlu1 %2934, %v3298_v41  }
 0x124   :  { %283 = vperm.xlu1 %2934, %v3305_v42  }
 0x177   :  { %v187_v51 = vpop.xlane.xlu0 %186 }
 0x178   :  { %v195_v52 = vmul.f32 0.03125, %v187_v51 }
 0x179   :  { %v207_v53 = vpop.xlane.xlu1 %206 }
 0x17a   :  { %v219_v54 = vmul.f32 %v195_v52, %v195_v52  ;;  %v215_v55 = vmul.f32 0.03125, %v207_v53  ;;  %v231_v25 = vsub.f32 %v3241_v13, %v195_v52 }
 0x17b   :  { %v184_v56 = vpop.xlane.xlu0 %183 }
 0x17c   :  { %v223_v57 = vsub.f32 %v215_v55, %v219_v54  ;;  %v194_v58 = vmul.f32 0.03125, %v184_v56 }
 0x17d   :  { %v204_v59 = vpop.xlane.xlu1 %203 }
 0x17e   :  { %v227_v60 = vmax.f32 %v223_v57, 0.0  ;;  %v218_v61 = vmul.f32 %v194_v58, %v194_v58  ;;  %v214_v62 = vmul.f32 0.03125, %v204_v59  ;;  %v230_v29 = vsub.f32 %v3243_v15, %v194_v58 }
 0x17f   :  { %v190_v63 = vpop.xlane.xlu0 %189 }
 0x180   :  { %v235_v0 = vadd.f32 1e-05, %v227_v60  ;;  %v222_v1 = vsub.f32 %v214_v62, %v218_v61  ;;  %v196_v2 = vmul.f32 0.03125, %v190_v63  ;;  %v3365_v63 = vld [vmem:[%s4195_s6 + $0x1] ss:$0 sm:$0xff] }
 0x181   :  { %v193_v3 = vpop.xlane.xlu1 %192 }
 0x182   :  { %2942 = vrsqrt.f32 %v235_v0  ;;  %v226_v4 = vmax.f32 %v222_v1, 0.0  ;;  %v220_v5 = vmul.f32 %v196_v2, %v196_v2  ;;  %v197_v6 = vmul.f32 0.03125, %v193_v3 }
 0x183   :  { %v210_v7 = vpop.xlane.xlu0 %209  ;;  %v232_v13 = vsub.f32 %v3252_v22, %v196_v2 }
 0x184   :  { %v234_v8 = vadd.f32 1e-05, %v226_v4  ;;  %v216_v9 = vmul.f32 0.03125, %v210_v7  ;;  %v221_v12 = vmul.f32 %v197_v6, %v197_v6  ;;  %v233_v48 = vsub.f32 %v3254_v23, %v197_v6  ;;  %v2349_v23 = vld [vmem:[%s4195_s6] ss:$0 sm:$0xff]  ;;  %s3100_s6 = smov 96  }
 0x185   :  { %v213_v11 = vpop.xlane.xlu1 %212 }
 0x186   :  { %2944 = vrsqrt.f32 %v234_v8  ;;  %v224_v14 = vsub.f32 %v216_v9, %v220_v5  ;;  %v217_v16 = vmul.f32 0.03125, %v213_v11 }
 0x188   :  { %v228_v17 = vmax.f32 %v224_v14, 0.0  ;;  %v225_v18 = vsub.f32 %v217_v16, %v221_v12 }
 0x189   :  { %v254_v19 = vpop.permute.xlu1 %253 }
 0x18a   :  { %v236_v20 = vadd.f32 1e-05, %v228_v17  ;;  %v229_v21 = vmax.f32 %v225_v18, 0.0 }
 0x18b   :  { %v249_v31 = vpop.permute.xlu0 %248 }
 0x18c   :  { %v2943_v24 = vpop.eup %2942  ;;  %2946 = vrsqrt.f32 %v236_v20  ;;  %v237_v26 = vadd.f32 1e-05, %v229_v21 }
 0x18d   :  { %v272_v27 = vpop.permute.xlu1 %271  ;;  %v243_v28 = vmul.f32 %v2943_v24, %v231_v25 }
 0x18e   :  { %2948 = vrsqrt.f32 %v237_v26 }
 0x18f   :  { %v267_v36 = vmul.f32 %v254_v19, %v243_v28 }
 0x190   :  { %v2945_v30 = vpop.eup %2944 }
 0x191   :  { %v276_v34 = vpop.permute.xlu1 %275  ;;  %v242_v35 = vmul.f32 %v2945_v30, %v230_v29 }
 0x192   :  { %v287_v39 = vadd.f32 %v276_v34, %v267_v36 }
 0x193   :  { %v266_v37 = vmul.f32 %v249_v31, %v242_v35 }
 0x195   :  { %v286_v38 = vadd.f32 %v272_v27, %v266_v37 }
 0x196   :  { %v259_v40 = vpop.permute.xlu1 %258  ;;  %v2947_v44 = vpop.eup %2946 }
 0x197   :  { %2535 = vmatprep.mubr.msk.f32.mxu0 %vm84_vm0, %v286_v38  ;;  %v244_v15 = vmul.f32 %v2947_v44, %v232_v13 }
 0x198   :  { %2536 = vmatmul.mubr.msk.f32.vlgmr.msra.gmra.mrb[4].mxu0 %vm84_vm0, %v287_v39  ;;  %v2949_v47 = vpop.eup %2948 }
 0x199   :  { %2675 = vmatpush3.bf16.msra.mxu0 %v3317_v46  ;;  %v268_v51 = vmul.f32 %v259_v40, %v244_v15  ;;  %v245_v52 = vmul.f32 %v2949_v47, %v233_v48 }
 0x19a   :  { %v264_v45 = vpop.permute.xlu1 %263  ;;  %2676 = vmatprep.subr.bf16.mxu0 %v3096_v43 }
 0x19b   :  { %v269_v22 = vmul.f32 %v264_v45, %v245_v52 }
 0x19d   :  { %2678 = vmatpush3.bf16.msra.mxu0 %v3328_v49 }
 0x19e   :  { %2685 = vmatprep.subr.bf16.mxu0 %v3096_v43 }
 0x19f   :  { %v280_v53 = vpop.permute.xlu1 %279 }
 0x1a0   :  { %v288_v54 = vadd.f32 %v280_v53, %v268_v51 }
 0x1a2   :  { %2538 = vmatprep.mubr.msk.f32.mxu0 %vm84_vm0, %v288_v54 }
 0x1a3   :  { %v284_v55 = vpop.permute.xlu1 %283 }
 0x1a4   :  { %v289_v56 = vadd.f32 %v284_v55, %v269_v22 }
 0x1a6   :  { %2539 = vmatmul.mubr.msk.f32.gmra.mrb[6].mxu0 %vm84_vm0, %v289_v56 }
 0x1a7   :  { %2549 = vmatprep.mubr.msk.f32.mxu0 %vm3097_vm1, %v3098_v50 }
 0x1aa   :  { %2550 = vmatmul.mubr.f32.vlgmr.msra.gmra.mrb[8].mxu0 %v3098_v50 }
 0x1ab   :  { %2687 = vmatpush3.bf16.msra.mxu0 %v3317_v46  ;;  %2571 = vmatprep.mubr.msk.f32.mxu0 %vm3097_vm1, %v3098_v50 }
 0x1ac   :  { %2688 = vmatprep.subr.bf16.mxu0 %v3096_v43 }
 0x1af   :  { %2690 = vmatpush3.bf16.msra.mxu0 %v3328_v49 }
 0x1b0   :  { %2697 = vmatprep.subr.bf16.mxu0 %v3096_v43 }
 0x26b   :  { %v2537_v57 = vpop.f32.mrb[4].mxu0 }
 0x26c   :  { %v3358_v58 = vadd.f32 %v2537_v57, %v2349_v23  ;;  %v378_v59 = vpop.f32.mrb[5].mxu0 }
 0x26d   :  { %v379_v4 = vadd.f32 %v2349_v23, %v378_v59 }
 0x26f   :  { %v401_v29 = vcombine.high %v379_v4, %v379_v4 }
 0x279   :  { %v2540_v60 = vpop.f32.mrb[6].mxu0 }
 0x27a   :  { %v3360_v61 = vadd.f32 %v2540_v60, %v2349_v23  ;;  %v388_v62 = vpop.f32.mrb[7].mxu0 }
 0x27b   :  { %v3367_v0 = vadd.f32 %v2349_v23, %v388_v62 }
 0x27d   :  { %v486_v1 = vpop.f32.mrb[8].mxu0 }
 0x27e   :  { %v487_v2 = vadd.f32 %v3365_v63, %v486_v1  ;;  %v2551_v3 = vpop.f32.mrb[9].mxu0 }
 0x280   :  { %498 = vrot.lane.b32.xlu1 %v487_v2, %s3099_s25  ;;  %v490_v5 = vadd.f32 %v487_v2, %v379_v4 }
 0x282   :  { %v2355_v6 = vmul.f32 -1.442695, %v490_v5 }
 0x284   :  { %2950 = vpow2.f32 %v2355_v6 }
 0x28e   :  { %v2951_v7 = vpop.eup %2950 }
 0x28f   :  { %v494_v8 = vadd.f32 1.0, %v2951_v7 }
 0x291   :  { %2952 = vrcp.f32 %v494_v8 }
 0x29b   :  { %v2953_v9 = vpop.eup %2952 }
 0x29c   :  { %v508_v18 = vsub.f32 1.0, %v2953_v9  ;;  %v514_v20 = vmul.f32 0.0, %v2953_v9 }
 0x2f2   :  { %v499_v11 = vpop.permute.xlu1 %498 }
 0x2f3   :  { %v501_v12 = vmul.f32 %v2953_v9, %v499_v11 }
 0x2f5   :  { %503 = vrot.lane.b32.xlu0 %v501_v12, %s3099_s25 }
 0x367   :  { %v504_v14 = vpop.permute.xlu0 %503 }
 0x368   :  { %v506_v16 = vadd.f32 %v504_v14, %v379_v4  ;;  %v402_v14 = vcombine.high %v3358_v58, %v3358_v58 }
 0x36a   :  { %2954 = vtanh.f32 %v506_v16 }
 0x374   :  { %v2955_v17 = vpop.eup %2954 }
 0x375   :  { %510 = vrot.lane.b32.xlu1 %v2955_v17, %s3100_s6 }
 0x3e7   :  { %v511_v19 = vpop.permute.xlu1 %510 }
 0x3e8   :  { %v513_v21 = vmul.f32 %v511_v19, %v508_v18 }
 0x3ea   :  { %v3373_v24 = vadd.f32 %v514_v20, %v513_v21 }
 0x3ec   :  { %517 = vrot.lane.b32.xlu0 %v3373_v24, %s3100_s6 }
 0x45e   :  { %v518_v25 = vpop.permute.xlu0 %517 }
 0x45f   :  { %2561 = vmatmul.mubr.msk.f32.vlgmr.msra.gmra.mrb[0].mxu1 %vm84_vm0, %v518_v25 }
 0x460   :  { %2693 = vmatpush3.bf16.msra.mxu1 %v3317_v46  ;;  %2582 = vmatprep.mubr.msk.f32.mxu1 %vm3097_vm1, %v3098_v50 }
 0x461   :  { %2694 = vmatprep.subr.bf16.mxu1 %v3096_v43 }
 0x464   :  { %2696 = vmatpush3.bf16.msra.mxu1 %v3328_v49 }
 0x465   :  { %2703 = vmatprep.subr.bf16.mxu1 %v3096_v43 }
 0x532   :  { %v587_v26 = vpop.f32.mrb[0].mxu1 }
 0x533   :  { %v588_v27 = vadd.f32 %v3365_v63, %v587_v26  ;;  %v2562_v28 = vpop.f32.mrb[1].mxu1 }
 0x535   :  { %599 = vrot.lane.b32.xlu1 %v588_v27, %s3099_s25  ;;  %v591_v30 = vadd.f32 %v588_v27, %v401_v29 }
 0x537   :  { %v2357_v31 = vmul.f32 -1.442695, %v591_v30 }
 0x539   :  { %2956 = vpow2.f32 %v2357_v31 }
 0x543   :  { %v2957_v34 = vpop.eup %2956 }
 0x544   :  { %v595_v35 = vadd.f32 1.0, %v2957_v34 }
 0x546   :  { %2958 = vrcp.f32 %v595_v35 }
 0x550   :  { %v2959_v36 = vpop.eup %2958 }
 0x551   :  { %v609_v13 = vsub.f32 1.0, %v2959_v36  ;;  %v615_v45 = vmul.f32 %v2959_v36, %v3373_v24 }
 0x5a7   :  { %v600_v37 = vpop.permute.xlu1 %599 }
 0x5a8   :  { %v602_v38 = vmul.f32 %v2959_v36, %v600_v37 }
 0x5aa   :  { %604 = vrot.lane.b32.xlu0 %v602_v38, %s3099_s25 }
 0x61c   :  { %v605_v39 = vpop.permute.xlu0 %604 }
 0x61d   :  { %v607_v40 = vadd.f32 %v605_v39, %v401_v29 }
 0x61f   :  { %2960 = vtanh.f32 %v607_v40 }
 0x629   :  { %v2961_v44 = vpop.eup %2960 }
 0x62a   :  { %611 = vrot.lane.b32.xlu1 %v2961_v44, %s3100_s6 }
 0x69c   :  { %v612_v15 = vpop.permute.xlu1 %611 }
 0x69d   :  { %v614_v47 = vmul.f32 %v612_v15, %v609_v13 }
 0x69f   :  { %v3389_v48 = vadd.f32 %v615_v45, %v614_v47 }
 0x6a1   :  { %618 = vrot.lane.b32.xlu0 %v3389_v48, %s3100_s6 }
 0x713   :  { %v619_v51 = vpop.permute.xlu0 %618 }
 0x714   :  { %2572 = vmatmul.mubr.msk.f32.vlgmr.msra.gmra.mrb[10].mxu0 %vm84_vm0, %v619_v51 }
 0x715   :  { %2699 = vmatpush3.bf16.msra.mxu0 %v3317_v46  ;;  %2593 = vmatprep.mubr.msk.f32.mxu0 %vm3097_vm1, %v3098_v50 }
 0x716   :  { %2700 = vmatprep.subr.bf16.mxu0 %v3096_v43 }
 0x719   :  { %2702 = vmatpush3.bf16.msra.mxu0 %v3328_v49 }
 0x71a   :  { %2709 = vmatprep.subr.bf16.mxu0 %v3096_v43 }
 0x7e7   :  { %v688_v52 = vpop.f32.mrb[10].mxu0 }
 0x7e8   :  { %v689_v53 = vadd.f32 %v3365_v63, %v688_v52  ;;  %v2573_v54 = vpop.f32.mrb[11].mxu0 }
 0x7ea   :  { %700 = vrot.lane.b32.xlu1 %v689_v53, %s3099_s25  ;;  %v692_v22 = vadd.f32 %v689_v53, %v3358_v58 }
 0x7ec   :  { %v2359_v55 = vmul.f32 -1.442695, %v692_v22 }
 0x7ee   :  { %2962 = vpow2.f32 %v2359_v55 }
 0x7f8   :  { %v2963_v56 = vpop.eup %2962 }
 0x7f9   :  { %v696_v23 = vadd.f32 1.0, %v2963_v56 }
 0x7fb   :  { %2964 = vrcp.f32 %v696_v23 }
 0x805   :  { %v2965_v57 = vpop.eup %2964 }
 0x806   :  { %v710_v3 = vsub.f32 1.0, %v2965_v57  ;;  %v716_v5 = vmul.f32 %v2965_v57, %v3389_v48 }
 0x85c   :  { %v701_v59 = vpop.permute.xlu1 %700 }
 0x85d   :  { %v703_v60 = vmul.f32 %v2965_v57, %v701_v59 }
 0x85f   :  { %705 = vrot.lane.b32.xlu0 %v703_v60, %s3099_s25 }
 0x8d1   :  { %v706_v62 = vpop.permute.xlu0 %705 }
 0x8d2   :  { %v708_v1 = vadd.f32 %v706_v62, %v3358_v58 }
 0x8d4   :  { %2966 = vtanh.f32 %v708_v1  ;;  %v403_v1 = vcombine.high %v3367_v0, %v3367_v0 }
 0x8de   :  { %v2967_v2 = vpop.eup %2966 }
 0x8df   :  { %712 = vrot.lane.b32.xlu1 %v2967_v2, %s3100_s6 }
 0x951   :  { %v713_v4 = vpop.permute.xlu1 %712 }
 0x952   :  { %v715_v6 = vmul.f32 %v713_v4, %v710_v3 }
 0x954   :  { %v3407_v7 = vadd.f32 %v716_v5, %v715_v6 }
 0x956   :  { %719 = vrot.lane.b32.xlu0 %v3407_v7, %s3100_s6 }
 0x9c8   :  { %v720_v8 = vpop.permute.xlu0 %719 }
 0x9c9   :  { %2583 = vmatmul.mubr.msk.f32.vlgmr.msra.gmra.mrb[2].mxu1 %vm84_vm0, %v720_v8 }
 0x9ca   :  { %2705 = vmatpush3.bf16.msra.mxu1 %v3317_v46  ;;  %2604 = vmatprep.mubr.msk.f32.mxu1 %vm3097_vm1, %v3098_v50 }
 0x9cb   :  { %2706 = vmatprep.subr.bf16.mxu1 %v3096_v43 }
 0x9ce   :  { %2708 = vmatpush3.bf16.msra.mxu1 %v3328_v49 }
 0x9cf   :  { %2715 = vmatprep.subr.bf16.mxu1 %v3096_v43 }
 0xa9c   :  { %v789_v9 = vpop.f32.mrb[2].mxu1 }
 0xa9d   :  { %v790_v11 = vadd.f32 %v3365_v63, %v789_v9  ;;  %v2584_v12 = vpop.f32.mrb[3].mxu1 }
 0xa9f   :  { %801 = vrot.lane.b32.xlu1 %v790_v11, %s3099_s25  ;;  %v793_v16 = vadd.f32 %v790_v11, %v402_v14 }
 0xaa1   :  { %v2361_v17 = vmul.f32 -1.442695, %v793_v16 }
 0xaa3   :  { %2968 = vpow2.f32 %v2361_v17 }
 0xaad   :  { %v2969_v18 = vpop.eup %2968 }
 0xaae   :  { %v797_v19 = vadd.f32 1.0, %v2969_v18 }
 0xab0   :  { %2970 = vrcp.f32 %v797_v19 }
 0xaba   :  { %v2971_v20 = vpop.eup %2970 }
 0xabb   :  { %v811_v29 = vsub.f32 1.0, %v2971_v20  ;;  %v817_v58 = vmul.f32 %v2971_v20, %v3407_v7 }
 0xb11   :  { %v802_v21 = vpop.permute.xlu1 %801 }
 0xb12   :  { %v804_v25 = vmul.f32 %v2971_v20, %v802_v21 }
 0xb14   :  { %806 = vrot.lane.b32.xlu0 %v804_v25, %s3099_s25 }
 0xb86   :  { %v807_v26 = vpop.permute.xlu0 %806 }
 0xb87   :  { %v809_v27 = vadd.f32 %v807_v26, %v402_v14 }
 0xb89   :  { %2972 = vtanh.f32 %v809_v27 }
 0xb93   :  { %v2973_v28 = vpop.eup %2972 }
 0xb94   :  { %813 = vrot.lane.b32.xlu1 %v2973_v28, %s3100_s6 }
 0xc06   :  { %v814_v30 = vpop.permute.xlu1 %813 }
 0xc07   :  { %v816_v31 = vmul.f32 %v814_v30, %v811_v29 }
 0xc09   :  { %v3425_v34 = vadd.f32 %v817_v58, %v816_v31 }
 0xc0b   :  { %820 = vrot.lane.b32.xlu0 %v3425_v34, %s3100_s6 }
 0xc7d   :  { %v821_v35 = vpop.permute.xlu0 %820 }
 0xc7e   :  { %2594 = vmatmul.mubr.msk.f32.vlgmr.msra.gmra.mrb[12].mxu0 %vm84_vm0, %v821_v35 }
 0xc7f   :  { %2711 = vmatpush3.bf16.msra.mxu0 %v3317_v46  ;;  %2615 = vmatprep.mubr.msk.f32.mxu0 %vm3097_vm1, %v3098_v50 }
 0xc80   :  { %2712 = vmatprep.subr.bf16.mxu0 %v3096_v43 }
 0xc83   :  { %2714 = vmatpush3.bf16.msra.mxu0 %v3328_v49 }
 0xd51   :  { %v890_v36 = vpop.f32.mrb[12].mxu0 }
 0xd52   :  { %v891_v37 = vadd.f32 %v3365_v63, %v890_v36  ;;  %v2595_v38 = vpop.f32.mrb[13].mxu0 }
 0xd54   :  { %902 = vrot.lane.b32.xlu1 %v891_v37, %s3099_s25  ;;  %v894_v39 = vadd.f32 %v891_v37, %v3367_v0 }
 0xd56   :  { %v2363_v40 = vmul.f32 -1.442695, %v894_v39 }
 0xd58   :  { %2974 = vpow2.f32 %v2363_v40 }
 0xd62   :  { %v2975_v44 = vpop.eup %2974 }
 0xd63   :  { %v898_v13 = vadd.f32 1.0, %v2975_v44 }
 0xd65   :  { %2976 = vrcp.f32 %v898_v13 }
 0xd6f   :  { %v2977_v15 = vpop.eup %2976 }
 0xd70   :  { %v912_v54 = vsub.f32 1.0, %v2977_v15  ;;  %v918_v55 = vmul.f32 %v2977_v15, %v3425_v34 }
 0xdc6   :  { %v903_v45 = vpop.permute.xlu1 %902 }
 0xdc7   :  { %v905_v47 = vmul.f32 %v2977_v15, %v903_v45 }
 0xdc9   :  { %907 = vrot.lane.b32.xlu0 %v905_v47, %s3099_s25  ;;  %v404_v47 = vcombine.high %v3360_v61, %v3360_v61 }
 0xe3b   :  { %v908_v51 = vpop.permute.xlu0 %907 }
 0xe3c   :  { %v910_v52 = vadd.f32 %v908_v51, %v3367_v0 }
 0xe3e   :  { %2978 = vtanh.f32 %v910_v52 }
 0xe48   :  { %v2979_v53 = vpop.eup %2978 }
 0xe49   :  { %914 = vrot.lane.b32.xlu1 %v2979_v53, %s3100_s6 }
 0xebb   :  { %v915_v22 = vpop.permute.xlu1 %914 }
 0xebc   :  { %v917_v56 = vmul.f32 %v915_v22, %v912_v54 }
 0xebe   :  { %v3442_v23 = vadd.f32 %v918_v55, %v917_v56 }
 0xec0   :  { %921 = vrot.lane.b32.xlu0 %v3442_v23, %s3100_s6 }
 0xf32   :  { %v922_v57 = vpop.permute.xlu0 %921 }
 0xf33   :  { %2605 = vmatmul.mubr.msk.f32.vlgmr.msra.gmra.mrb[4].mxu1 %vm84_vm0, %v922_v57  ;;  %v1224_v57 = vld [vmem:[%s4196_s7 + $0x8] sm:$0xff] }
 0xf34   :  { %2717 = vmatpush3.bf16.msra.mxu1 %v3317_v46  ;;  %2626 = vmatprep.mubr.msk.f32.mxu1 %vm3097_vm1, %v3098_v50 }
 0xf35   :  { %2718 = vmatprep.subr.bf16.mxu1 %v3096_v43 }
 0xf38   :  { %2720 = vmatpush3.bf16.msra.mxu1 %v3328_v49 }
0x1006   :  { %v991_v59 = vpop.f32.mrb[4].mxu1 }
0x1007   :  { %v992_v60 = vadd.f32 %v3365_v63, %v991_v59  ;;  %v2606_v62 = vpop.f32.mrb[5].mxu1 }
0x1009   :  { %1003 = vrot.lane.b32.xlu1 %v992_v60, %s3099_s25  ;;  %v995_v2 = vadd.f32 %v992_v60, %v403_v1 }
0x100b   :  { %v2365_v3 = vmul.f32 -1.442695, %v995_v2 }
0x100d   :  { %2980 = vpow2.f32 %v2365_v3 }
0x1017   :  { %v2981_v46 = vpop.eup %2980 }
0x1018   :  { %v999_v4 = vadd.f32 1.0, %v2981_v46  ;;  %v1236_v46 = vcombine.low %v3407_v7, %v3425_v34  ;;  %v2370_v34 = vld [vmem:[%s4197_s8] ss:$0 sm:$0xff] }
0x101a   :  { %2982 = vrcp.f32 %v999_v4 }
0x1024   :  { %v2983_v5 = vpop.eup %2982 }
0x1025   :  { %v1013_v11 = vsub.f32 1.0, %v2983_v5  ;;  %v1019_v0 = vmul.f32 %v2983_v5, %v3442_v23 }
0x107b   :  { %v1004_v6 = vpop.permute.xlu1 %1003 }
0x107c   :  { %v1006_v43 = vmul.f32 %v2983_v5, %v1004_v6 }
0x107e   :  { %1008 = vrot.lane.b32.xlu0 %v1006_v43, %s3099_s25 }
0x10f0   :  { %v1009_v49 = vpop.permute.xlu0 %1008 }
0x10f1   :  { %v1011_v8 = vadd.f32 %v1009_v49, %v403_v1 }
0x10f3   :  { %2984 = vtanh.f32 %v1011_v8 }
0x10fd   :  { %v2985_v9 = vpop.eup %2984 }
0x10fe   :  { %1015 = vrot.lane.b32.xlu1 %v2985_v9, %s3100_s6 }
0x1170   :  { %v1016_v12 = vpop.permute.xlu1 %1015 }
0x1171   :  { %v1018_v14 = vmul.f32 %v1016_v12, %v1013_v11  ;;  %v3101_v12 = vmov 2  }
0x1172   :  { %2935 = vset.pattern.permute.xlu1 %v3101_v12  ;;  %2936 = vset.pattern.permute.xlu0 %v3101_v12 }
0x1173   :  { %v1020_v16 = vadd.f32 %v1019_v0, %v1018_v14 }
0x1175   :  { %1022 = vrot.lane.b32.xlu0 %v1020_v16, %s3100_s6  ;;  %v1237_v59 = vcombine.low %v3442_v23, %v1020_v16 }
0x11e7   :  { %v1023_v17 = vpop.permute.xlu0 %1022 }
0x11e8   :  { %2616 = vmatmul.mubr.msk.f32.vlgmr.msra.gmra.mrb[14].mxu0 %vm84_vm0, %v1023_v17 }
0x12bb   :  { %v1092_v18 = vpop.f32.mrb[14].mxu0 }
0x12bc   :  { %v1093_v19 = vadd.f32 %v3365_v63, %v1092_v18  ;;  %v2617_v20 = vpop.f32.mrb[15].mxu0 }
0x12be   :  { %1104 = vrot.lane.b32.xlu1 %v1093_v19, %s3099_s25  ;;  %v1096_v21 = vadd.f32 %v1093_v19, %v3360_v61 }
0x12c0   :  { %v2367_v25 = vmul.f32 -1.442695, %v1096_v21 }
0x12c2   :  { %2986 = vpow2.f32 %v2367_v25 }
0x12cc   :  { %v2987_v26 = vpop.eup %2986 }
0x12cd   :  { %v1100_v27 = vadd.f32 1.0, %v2987_v26 }
0x12cf   :  { %2988 = vrcp.f32 %v1100_v27  ;;  %v3102_v27 = vmov 3  }
0x12d9   :  { %v2989_v28 = vpop.eup %2988 }
0x12da   :  { %v1114_v36 = vsub.f32 1.0, %v2989_v28  ;;  %v1120_v38 = vmul.f32 %v2989_v28, %v1020_v16 }
0x1330   :  { %v1105_v29 = vpop.permute.xlu1 %1104 }
0x1331   :  { %v1107_v30 = vmul.f32 %v2989_v28, %v1105_v29 }
0x1333   :  { %1109 = vrot.lane.b32.xlu0 %v1107_v30, %s3099_s25 }
0x13a5   :  { %v1110_v58 = vpop.permute.xlu0 %1109 }
0x13a6   :  { %v1112_v31 = vadd.f32 %v1110_v58, %v3360_v61  ;;  %v1223_v61 = vld [vmem:[%s4196_s7] sm:$0xff] }
0x13a7   :  { %v2721_v60 = vpack.c.bf16 %v1224_v57, %v1223_v61  ;;  %v1580_v57 = vld [vmem:[%s4199_s12] sm:$0xff] }
0x13a8   :  { %2990 = vtanh.f32 %v1112_v31 }
0x13a9   :  { %2722 = vmatprep.subr.bf16.mxu0 %v2721_v60 }
0x13aa   :  { %2724 = vmatpush3.bf16.msra.mxu0 %v2721_v60 }
0x13b2   :  { %v2991_v35 = vpop.eup %2990 }
0x13b3   :  { %1116 = vrot.lane.b32.xlu1 %v2991_v35, %s3100_s6 }
0x1425   :  { %v1117_v37 = vpop.permute.xlu1 %1116 }
0x1426   :  { %v1119_v39 = vmul.f32 %v1117_v37, %v1114_v36 }
0x1428   :  { %v1121_v40 = vadd.f32 %v1120_v38, %v1119_v39  ;;  %v1448_v38 = vld [vmem:[%s4198_s9] sm:$0xff]  ;;  %v1449_v39 = vld [vmem:[%s4198_s9 + $0x8] sm:$0xff] }
0x142a   :  { %1123 = vrot.lane.b32.xlu0 %v1121_v40, %s3100_s6 }
0x149c   :  { %v1124_v44 = vpop.permute.xlu0 %1123 }
0x149d   :  { %2627 = vmatmul.mubr.msk.f32.vlgmr.msra.gmra.mrb[6].mxu1 %vm84_vm0, %v1124_v44 }
0x149e   :  { %1820 = vmatprep.mubr.f32.mxu1 %v3098_v50 }
0x1570   :  { %v1193_v13 = vpop.f32.mrb[6].mxu1 }
0x1571   :  { %v1194_v15 = vadd.f32 %v3365_v63, %v1193_v13  ;;  %v2628_v45 = vpop.f32.mrb[7].mxu1  ;;  %v1235_v63 = vcombine.low %v3373_v24, %v3389_v48  ;;  %v1225_v24 = vld [vmem:[%s4196_s7 + $0x10] sm:$0xff]  ;;  %v1226_v48 = vld [vmem:[%s4196_s7 + $0x18] sm:$0xff] }
0x1572   :  { %v2725_v1 = vpack.c.bf16 %v1226_v48, %v1225_v24  ;;  %v1583_v24 = vld [vmem:[%s4199_s12 + $0x18] sm:$0xff] }
0x1573   :  { %1205 = vrot.lane.b32.xlu1 %v1194_v15, %s3099_s25  ;;  %v1197_v51 = vadd.f32 %v1194_v15, %v404_v47 }
0x1574   :  { %2726 = vmatprep.subr.bf16.mxu0 %v2725_v1 }
0x1575   :  { %v2369_v52 = vmul.f32 -1.442695, %v1197_v51  ;;  %2728 = vmatpush3.bf16.msra.mxu0 %v2725_v1 }
0x1577   :  { %2992 = vpow2.f32 %v2369_v52 }
0x1581   :  { %v2993_v53 = vpop.eup %2992 }
0x1582   :  { %v1201_v54 = vadd.f32 1.0, %v2993_v53 }
0x1584   :  { %2994 = vrcp.f32 %v1201_v54 }
0x158e   :  { %v2995_v22 = vpop.eup %2994 }
0x158f   :  { %v1215_v4 = vsub.f32 1.0, %v2995_v22  ;;  %v1221_v6 = vmul.f32 %v2995_v22, %v1121_v40 }
0x15e5   :  { %v1206_v55 = vpop.permute.xlu1 %1205 }
0x15e6   :  { %v1208_v56 = vmul.f32 %v2995_v22, %v1206_v55 }
0x15e8   :  { %1210 = vrot.lane.b32.xlu0 %v1208_v56, %s3099_s25 }
0x15ec   :  { %1239 = vrot.lane.b32.xlu0 %v1235_v63, %s3100_s6 }
0x15f0   :  { %1243 = vrot.lane.b32.xlu0 %v1237_v59, %s3100_s6 }
0x165a   :  { %v1211_v62 = vpop.permute.xlu0 %1210 }
0x165b   :  { %v1213_v2 = vadd.f32 %v1211_v62, %v404_v47 }
0x165d   :  { %2996 = vtanh.f32 %v1213_v2 }
0x165e   :  { %v1240_v23 = vpop.permute.xlu0 %1239 }
0x165f   :  { %2637 = vmatprep.mubr.msk.f32.mxu0 %vm84_vm0, %v1240_v23 }
0x1662   :  { %v1244_v9 = vpop.permute.xlu0 %1243 }
0x1667   :  { %v2997_v3 = vpop.eup %2996 }
0x1668   :  { %1217 = vrot.lane.b32.xlu1 %v2997_v3, %s3100_s6 }
0x166c   :  { %1241 = vrot.lane.b32.xlu1 %v1236_v46, %s3100_s6 }
0x16da   :  { %v1218_v5 = vpop.permute.xlu1 %1217 }
0x16db   :  { %v1220_v43 = vmul.f32 %v1218_v5, %v1215_v4 }
0x16dd   :  { %v1222_v49 = vadd.f32 %v1221_v6, %v1220_v43 }
0x16de   :  { %v1242_v8 = vpop.permute.xlu1 %1241 }
0x16df   :  { %2638 = vmatmul.mubr.msk.f32.vlgmr.msra.gmra.mrb[16].mxu0 %vm84_vm0, %v1242_v8  ;;  %v1238_v11 = vcombine.low %v1121_v40, %v1222_v49  ;;  %v1451_v40 = vld [vmem:[%s4198_s9 + $0x18] sm:$0xff] }
0x16e0   :  { %2640 = vmatprep.mubr.msk.f32.mxu0 %vm84_vm0, %v1244_v9 }
0x16e1   :  { %1245 = vrot.lane.b32.xlu1 %v1238_v11, %s3100_s6 }
0x1753   :  { %v1246_v7 = vpop.permute.xlu1 %1245 }
0x1754   :  { %2641 = vmatmul.mubr.msk.f32.gmra.mrb[18].mxu0 %vm84_vm0, %v1246_v7 }
0x17b2   :  { %v2639_v0 = vpop.f32.mrb[16].mxu0 }
0x17b3   :  { %v3504_v14 = vadd.f32 %v2639_v0, %v2370_v34  ;;  %v1321_v16 = vpop.f32.mrb[17].mxu0 }
0x17b4   :  { %v3506_v17 = vadd.f32 %v2370_v34, %v1321_v16 }
0x17b5   :  { %v1343_v18 = vsel %vm84_vm0, %v3504_v14, 0.0  ;;  %v1357_v25 = vmul.f32 %v3504_v14, %v3504_v14 }
0x17b6   :  { %1344 = vadd.xlane.f32.xlu1 %v1343_v18  ;;  %v1340_v19 = vsel %vm84_vm0, %v3506_v17, 0.0  ;;  %v1356_v20 = vmul.f32 %v3506_v17, %v3506_v17 }
0x17b7   :  { %1341 = vadd.xlane.f32.xlu0 %v1340_v19  ;;  %v1363_v26 = vsel %vm84_vm0, %v1357_v25, 0.0 }
0x17b8   :  { %v1360_v21 = vsel %vm84_vm0, %v1356_v20, 0.0 }
0x17bb   :  { %1361 = vadd.xlane.f32.xlu0 %v1360_v21 }
0x17bf   :  { %1364 = vadd.xlane.f32.xlu0 %v1363_v26 }
0x17c7   :  { %1405 = vperm.xlu1 %2935, %v3278_v33  }
0x17cb   :  { %2937 = vset.pattern.permute.xlu1 %v3102_v27 }
0x1827   :  { %v2642_v28 = vpop.f32.mrb[18].mxu0 }
0x1828   :  { %v3519_v29 = vadd.f32 %v2642_v28, %v2370_v34  ;;  %v1331_v30 = vpop.f32.mrb[19].mxu0 }
0x1829   :  { %v3521_v58 = vadd.f32 %v2370_v34, %v1331_v30 }
0x182a   :  { %v1349_v31 = vsel %vm84_vm0, %v3519_v29, 0.0  ;;  %v1359_v35 = vmul.f32 %v3519_v29, %v3519_v29 }
0x182b   :  { %1350 = vadd.xlane.f32.xlu0 %v1349_v31  ;;  %v1346_v36 = vsel %vm84_vm0, %v3521_v58, 0.0  ;;  %v1358_v13 = vmul.f32 %v3521_v58, %v3521_v58 }
0x182c   :  { %1347 = vadd.xlane.f32.xlu1 %v1346_v36  ;;  %v1369_v37 = vsel %vm84_vm0, %v1359_v35, 0.0 }
0x182d   :  { %v1366_v15 = vsel %vm84_vm0, %v1358_v13, 0.0 }
0x182f   :  { %1370 = vadd.xlane.f32.xlu0 %v1369_v37 }
0x183d   :  { %1425 = vperm.xlu1 %2937, %v3278_v33   ;;  %v2729_v33 = vpack.c.bf16 %v1449_v39, %v1448_v38 }
0x183f   :  { %2730 = vmatprep.subr.bf16.mxu0 %v2729_v33 }
0x1840   :  { %2732 = vmatpush3.bf16.msra.mxu0 %v2729_v33 }
0x1841   :  { %1429 = vperm.xlu1 %2937, %v3272_v32  }
0x1844   :  { %v1342_v45 = vpop.xlane.xlu0 %1341 }
0x1845   :  { %1409 = vperm.xlu0 %2936, %v3272_v32   ;;  %2938 = vset.pattern.permute.xlu1 %v3101_v12  ;;  %v1450_v32 = vld [vmem:[%s4198_s9 + $0x10] sm:$0xff]  ;;  %v1352_v51 = vmul.f32 0.03125, %v1342_v45 }
0x1846   :  { %1413 = vperm.xlu1 %2938, %v3298_v41   ;;  %v2733_v44 = vpack.c.bf16 %v1451_v40, %v1450_v32 }
0x1847   :  { %v1376_v53 = vmul.f32 %v1352_v51, %v1352_v51  ;;  %v1388_v23 = vsub.f32 %v3506_v17, %v1352_v51 }
0x1848   :  { %2734 = vmatprep.subr.bf16.mxu0 %v2733_v44  ;;  %v1362_v47 = vpop.xlane.xlu0 %1361 }
0x1849   :  { %2941 = vset.pattern.permute.xlu0 %v3094_v10  ;;  %2736 = vmatpush3.bf16.msra.mxu0 %v2733_v44  ;;  %v1372_v52 = vmul.f32 0.03125, %v1362_v47 }
0x184a   :  { %1417 = vperm.xlu1 %2938, %v3305_v42  }
0x184b   :  { %v1380_v54 = vsub.f32 %v1372_v52, %v1376_v53 }
0x184c   :  { %v1365_v55 = vpop.xlane.xlu0 %1364 }
0x184d   :  { %v1384_v22 = vmax.f32 %v1380_v54, 0.0  ;;  %v1373_v63 = vmul.f32 0.03125, %v1365_v55 }
0x184e   :  { %2939 = vset.pattern.permute.xlu1 %v3102_v27 }
0x184f   :  { %1433 = vperm.xlu1 %2939, %v3298_v41   ;;  %v1345_v41 = vpop.xlane.xlu1 %1344  ;;  %v1392_v61 = vadd.f32 1e-05, %v1384_v22  ;;  %v1627_v22 = vld [vmem:[%s4200_s14 + $0x18] sm:$0xff] }
0x1850   :  { %v1353_v56 = vmul.f32 0.03125, %v1345_v41  ;;  %v1629_v41 = vld [vmem:[%s4200_s14 + $0x28] sm:$0xff] }
0x1851   :  { %2998 = vrsqrt.f32 %v1392_v61  ;;  %v1628_v61 = vld [vmem:[%s4200_s14 + $0x20] sm:$0xff] }
0x1852   :  { %v1377_v59 = vmul.f32 %v1353_v56, %v1353_v56  ;;  %v1389_v34 = vsub.f32 %v3504_v14, %v1353_v56  ;;  %v1631_v56 = vld [vmem:[%s4200_s14 + $0x38] sm:$0xff] }
0x1853   :  { %v1406_v2 = vpop.permute.xlu1 %1405 }
0x1854   :  { %v1381_v60 = vsub.f32 %v1373_v63, %v1377_v59  ;;  %v1624_v63 = vld [vmem:[%s4200_s14] sm:$0xff] }
0x1855   :  { %v2739_v59 = vpack.c.bf16 %v1628_v61, %v1624_v63  ;;  %v1933_v61 = vld [vmem:[%s4201_s16 + $0x240] sm:$0xff] }
0x1856   :  { %v1385_v48 = vmax.f32 %v1381_v60, 0.0 }
0x1858   :  { %v1393_v62 = vadd.f32 1e-05, %v1385_v48  ;;  %v1864_v48 = vld [vmem:[%s4201_s16 + $0x18] sm:$0xff] }
0x185a   :  { %3000 = vrsqrt.f32 %v1393_v62  ;;  %v1926_v62 = vld [vmem:[%s4201_s16 + $0x208] sm:$0xff] }
0x185b   :  { %v2999_v1 = vpop.eup %2998 }
0x185c   :  { %v1400_v3 = vmul.f32 %v2999_v1, %v1388_v23 }
0x185e   :  { %v1420_v6 = vmul.f32 %v1406_v2, %v1400_v3  ;;  %v1928_v2 = vld [vmem:[%s4201_s16 + $0x218] sm:$0xff]  ;;  %v3614_v3 = vld [vmem:[%s4202_s10] ss:$0 sm:$0xff] }
0x185f   :  { %v2809_v23 = vpack.c.bf16 %v1928_v2, %v1926_v62  ;;  %v1873_v62 = vld [vmem:[%s4201_s16 + $0x60] sm:$0xff] }
0x1864   :  { %v3001_v7 = vpop.eup %3000 }
0x1865   :  { %v1401_v18 = vmul.f32 %v3001_v7, %v1389_v34  ;;  %v1584_v34 = vld [vmem:[%s4203_s11] sm:$0xff] }
0x1873   :  { %1367 = vadd.xlane.f32.xlu1 %v1366_v15 }
0x1884   :  { %1437 = vperm.xlu1 %2939, %v3305_v42   ;;  %v1581_v42 = vld [vmem:[%s4199_s12 + $0x8] sm:$0xff] }
0x1888   :  { %2940 = vset.pattern.permute.xlu1 %v3094_v10  ;;  %v1582_v10 = vld [vmem:[%s4199_s12 + $0x10] sm:$0xff] }
0x1889   :  { %1594 = vperm.xlu1 %2940, %v1580_v57   ;;  %1604 = vperm.xlu0 %2941, %v1582_v10   ;;  %v2741_v57 = vpack.c.bf16 %v1631_v56, %v1627_v22  ;;  %v1626_v10 = vld [vmem:[%s4200_s14 + $0x10] sm:$0xff]  ;;  %v1869_v22 = vld [vmem:[%s4201_s16 + $0x40] sm:$0xff] }
0x188b   :  { %2742 = vmatprep.subr.bf16.mxu1 %v2741_v57  ;;  %v1935_v57 = vld [vmem:[%s4201_s16 + $0x250] sm:$0xff] }
0x188d   :  { %1599 = vperm.xlu1 %2940, %v1581_v42   ;;  %v1630_v42 = vld [vmem:[%s4200_s14 + $0x30] sm:$0xff] }
0x188e   :  { %v2743_v60 = vpack.c.bf16 %v1630_v42, %v1626_v10  ;;  %v1876_v10 = vld [vmem:[%s4201_s16 + $0x78] sm:$0xff]  ;;  %v1938_v42 = vld [vmem:[%s4201_s16 + $0x268] sm:$0xff] }
0x1890   :  { %2744 = vmatpush1.bf16.msra.mxu1 %v2743_v60  ;;  %v1940_v60 = vld [vmem:[%s4201_s16 + $0x278] sm:$0xff] }
0x1891   :  { %1609 = vperm.xlu1 %2940, %v1583_v24   ;;  %v1862_v24 = vld [vmem:[%s4201_s16 + $0x8] sm:$0xff] }
0x1892   :  { %v2745_v1 = vpack.c.bf16 %v1864_v48, %v1862_v24  ;;  %v2819_v48 = vpack.c.bf16 %v1935_v57, %v1933_v61  ;;  %v1894_v61 = vld [vmem:[%s4201_s16 + $0x108] sm:$0xff]  ;;  %v1896_v57 = vld [vmem:[%s4201_s16 + $0x118] sm:$0xff] }
0x1894   :  { %2746 = vmatprep.subr.bf16.mxu1 %v2745_v1  ;;  %v1875_v1 = vld [vmem:[%s4201_s16 + $0x70] sm:$0xff] }
0x18b8   :  { %v1351_v46 = vpop.xlane.xlu0 %1350 }
0x18b9   :  { %v1355_v4 = vmul.f32 0.03125, %v1351_v46  ;;  %v1348_v5 = vpop.xlane.xlu1 %1347 }
0x18ba   :  { %v1354_v36 = vmul.f32 0.03125, %v1348_v5 }
0x18bb   :  { %v1379_v49 = vmul.f32 %v1355_v4, %v1355_v4  ;;  %v1391_v26 = vsub.f32 %v3519_v29, %v1355_v4 }
0x18bc   :  { %v1371_v43 = vpop.xlane.xlu0 %1370  ;;  %v1378_v38 = vmul.f32 %v1354_v36, %v1354_v36  ;;  %v1390_v44 = vsub.f32 %v3521_v58, %v1354_v36  ;;  %v1625_v58 = vld [vmem:[%s4200_s14 + $0x8] sm:$0xff]  ;;  %v1932_v36 = vld [vmem:[%s4201_s16 + $0x238] sm:$0xff] }
0x18bd   :  { %v1375_v8 = vmul.f32 0.03125, %v1371_v43  ;;  %v1426_v9 = vpop.permute.xlu1 %1425  ;;  %v2737_v55 = vpack.c.bf16 %v1629_v41, %v1625_v58 }
0x18be   :  { %v1440_v11 = vadd.f32 %v1426_v9, %v1420_v6 }
0x18bf   :  { %v1383_v12 = vsub.f32 %v1375_v8, %v1379_v49  ;;  %2738 = vmatprep.subr.bf16.mxu0 %v2737_v55  ;;  %v1871_v55 = vld [vmem:[%s4201_s16 + $0x50] sm:$0xff] }
0x18c0   :  { %3002 = vtanh.f32 %v1440_v11  ;;  %v2755_v24 = vpack.c.bf16 %v1871_v55, %v1869_v22 }
0x18c1   :  { %v1387_v0 = vmax.f32 %v1383_v12, 0.0  ;;  %v1430_v20 = vpop.permute.xlu1 %1429 }
0x18c3   :  { %v1395_v16 = vadd.f32 1e-05, %v1387_v0  ;;  %v1585_v0 = vld [vmem:[%s4203_s11 + $0x8] sm:$0xff] }
0x18c4   :  { %v1410_v17 = vpop.permute.xlu0 %1409 }
0x18c5   :  { %3004 = vrsqrt.f32 %v1395_v16  ;;  %v1421_v19 = vmul.f32 %v1410_v17, %v1401_v18  ;;  %v1414_v14 = vpop.permute.xlu1 %1413  ;;  %v1616_v17 = vld [vmem:[%s4204_s13] sm:$0xff] }
0x18c7   :  { %v1441_v21 = vadd.f32 %v1430_v20, %v1421_v19 }
0x18c9   :  { %3006 = vtanh.f32 %v1441_v21  ;;  %v1418_v31 = vpop.permute.xlu1 %1417  ;;  %v1861_v21 = vld [vmem:[%s4201_s16] sm:$0xff] }
0x18ca   :  { %v3003_v25 = vpop.eup %3002 }
0x18cb   :  { %2651 = vmatprep.mubr.msk.f32.mxu0 %vm84_vm0, %v3003_v25  ;;  %v1863_v25 = vld [vmem:[%s4201_s16 + $0x10] sm:$0xff] }
0x18ce   :  { %v1434_v35 = vpop.permute.xlu1 %1433 }
0x18cf   :  { %v3005_v27 = vpop.eup %3004 }
0x18d0   :  { %v1403_v28 = vmul.f32 %v3005_v27, %v1391_v26  ;;  %v1925_v27 = vld [vmem:[%s4201_s16 + $0x200] sm:$0xff] }
0x18d2   :  { %v1423_v45 = vmul.f32 %v1418_v31, %v1403_v28  ;;  %v1927_v28 = vld [vmem:[%s4201_s16 + $0x210] sm:$0xff]  ;;  %v1868_v31 = vld [vmem:[%s4201_s16 + $0x38] sm:$0xff] }
0x18d3   :  { %v3007_v30 = vpop.eup %3006 }
0x18d4   :  { %2652 = vmatmul.mubr.msk.f32.vlgmr.msra.gmra.mrb[20].mxu0 %vm84_vm0, %v3007_v30  ;;  %v1866_v30 = vld [vmem:[%s4201_s16 + $0x28] sm:$0xff] }
0x18d5   :  { %2740 = vmatpush1.bf16.msra.mxu0 %v2739_v59  ;;  %v1874_v59 = vld [vmem:[%s4201_s16 + $0x68] sm:$0xff] }
0x18d6   :  { %2810 = vmatprep.subr.bf16.mxu0 %v2809_v23  ;;  %v2757_v2 = vpack.c.bf16 %v1876_v10, %v1874_v59  ;;  %v2821_v23 = vpack.c.bf16 %v1940_v60, %v1938_v42  ;;  %v1958_v59 = vld [vmem:[%s4201_s16 + $0x308] sm:$0xff]  ;;  %v1960_v10 = vld [vmem:[%s4201_s16 + $0x318] sm:$0xff] }
0x1900   :  { %v1368_v37 = vpop.xlane.xlu1 %1367 }
0x1901   :  { %v1374_v39 = vmul.f32 0.03125, %v1368_v37 }
0x1903   :  { %v1382_v33 = vsub.f32 %v1374_v39, %v1378_v38  ;;  %v1617_v38 = vld [vmem:[%s4204_s13 + $0x8] sm:$0xff] }
0x1904   :  { %v1438_v15 = vpop.permute.xlu1 %1437 }
0x1905   :  { %v1386_v32 = vmax.f32 %v1382_v33, 0.0  ;;  %v1443_v51 = vadd.f32 %v1438_v15, %v1423_v45  ;;  %v2747_v33 = vpack.c.bf16 %v1863_v25, %v1861_v21  ;;  %v1929_v15 = vld [vmem:[%s4201_s16 + $0x220] sm:$0xff]  ;;  %v1931_v45 = vld [vmem:[%s4201_s16 + $0x230] sm:$0xff] }
0x1906   :  { %v2815_v41 = vpack.c.bf16 %v1931_v45, %v1929_v15  ;;  %v1951_v15 = vld [vmem:[%s4201_s16 + $0x2d0] sm:$0xff]  ;;  %v1890_v45 = vld [vmem:[%s4201_s16 + $0xe8] sm:$0xff] }
0x1907   :  { %v1394_v40 = vadd.f32 1e-05, %v1386_v32  ;;  %v2811_v32 = vpack.c.bf16 %v1927_v28, %v1925_v27  ;;  %v1883_v27 = vld [vmem:[%s4201_s16 + $0xb0] sm:$0xff] }
0x1908   :  { %v1595_v7 = vpop.permute.xlu1 %1594 }
0x1909   :  { %3008 = vrsqrt.f32 %v1394_v40  ;;  %v1865_v40 = vld [vmem:[%s4201_s16 + $0x20] sm:$0xff] }
0x190c   :  { %v1600_v26 = vpop.permute.xlu1 %1599 }
0x1913   :  { %v3009_v13 = vpop.eup %3008 }
0x1914   :  { %v1402_v29 = vmul.f32 %v3009_v13, %v1390_v44  ;;  %v1867_v44 = vld [vmem:[%s4201_s16 + $0x30] sm:$0xff]  ;;  %v2749_v13 = vpack.c.bf16 %v1868_v31, %v1866_v30 }
0x1915   :  { %v2751_v58 = vpack.c.bf16 %v1867_v44, %v1865_v40  ;;  %v1947_v31 = vld [vmem:[%s4201_s16 + $0x2b0] sm:$0xff] }
0x1916   :  { %v1422_v47 = vmul.f32 %v1414_v14, %v1402_v29  ;;  %v1887_v40 = vld [vmem:[%s4201_s16 + $0xd0] sm:$0xff] }
0x1918   :  { %v1442_v52 = vadd.f32 %v1434_v35, %v1422_v47  ;;  %v1930_v35 = vld [vmem:[%s4201_s16 + $0x228] sm:$0xff] }
0x1919   :  { %v2813_v29 = vpack.c.bf16 %v1932_v36, %v1930_v35  ;;  %v1870_v47 = vld [vmem:[%s4201_s16 + $0x48] sm:$0xff]  ;;  %v1888_v36 = vld [vmem:[%s4201_s16 + $0xd8] sm:$0xff] }
0x191a   :  { %3010 = vtanh.f32 %v1442_v52  ;;  %v1934_v52 = vld [vmem:[%s4201_s16 + $0x248] sm:$0xff] }
0x191b   :  { %3012 = vtanh.f32 %v1443_v51  ;;  %v1872_v51 = vld [vmem:[%s4201_s16 + $0x58] sm:$0xff]  ;;  %v1886_v35 = vld [vmem:[%s4201_s16 + $0xc8] sm:$0xff] }
0x191c   :  { %v2753_v56 = vpack.c.bf16 %v1872_v51, %v1870_v47  ;;  %v2769_v44 = vpack.c.bf16 %v1888_v36, %v1886_v35  ;;  %v1892_v47 = vld [vmem:[%s4201_s16 + $0xf8] sm:$0xff]  ;;  %v1954_v51 = vld [vmem:[%s4201_s16 + $0x2e8] sm:$0xff] }
0x191d   :  { %v2773_v22 = vpack.c.bf16 %v1892_v47, %v1890_v45  ;;  %v1970_v35 = vld [vmem:[%s4201_s16 + $0x368] sm:$0xff]  ;;  %v1972_v36 = vld [vmem:[%s4201_s16 + $0x378] sm:$0xff] }
0x1924   :  { %v3011_v53 = vpop.eup %3010 }
0x1925   :  { %v3013_v54 = vpop.eup %3012  ;;  %2654 = vmatprep.mubr.msk.f32.mxu0 %vm84_vm0, %v3011_v53  ;;  %v1936_v53 = vld [vmem:[%s4201_s16 + $0x258] sm:$0xff] }
0x1926   :  { %2655 = vmatmul.mubr.msk.f32.gmra.mrb[22].mxu0 %vm84_vm0, %v3013_v54  ;;  %v2817_v63 = vpack.c.bf16 %v1936_v53, %v1934_v52  ;;  %v1956_v52 = vld [vmem:[%s4201_s16 + $0x2f8] sm:$0xff] }
0x1927   :  { %1731 = vmatprep.mubr.f32.mxu0 %v3098_v50  ;;  %v2837_v55 = vpack.c.bf16 %v1956_v52, %v1954_v51 }
0x19a7   :  { %v2653_v46 = vpop.f32.mrb[20].mxu0 }
0x19a8   :  { %v1543_v4 = vadd.f32 %v2653_v46, %v3614_v3  ;;  %v1537_v5 = vpop.f32.mrb[21].mxu0  ;;  %v1937_v46 = vld [vmem:[%s4201_s16 + $0x260] sm:$0xff] }
0x19a9   :  { %v1538_v6 = vadd.f32 %v3614_v3, %v1537_v5  ;;  %v1878_v5 = vld [vmem:[%s4201_s16 + $0x88] sm:$0xff] }
0x19aa   :  { %v2381_v43 = vmul.f32 -1.442695, %v1543_v4  ;;  %v1939_v4 = vld [vmem:[%s4201_s16 + $0x270] sm:$0xff] }
0x19ab   :  { %v2380_v49 = vmul.f32 -1.442695, %v1538_v6  ;;  %v1880_v6 = vld [vmem:[%s4201_s16 + $0x98] sm:$0xff] }
0x19ac   :  { %3014 = vpow2.f32 %v2381_v43  ;;  %v1942_v43 = vld [vmem:[%s4201_s16 + $0x288] sm:$0xff] }
0x19ad   :  { %3016 = vpow2.f32 %v2380_v49  ;;  %v1944_v49 = vld [vmem:[%s4201_s16 + $0x298] sm:$0xff] }
0x19b6   :  { %v3015_v8 = vpop.eup %3014 }
0x19b7   :  { %v3017_v9 = vpop.eup %3016  ;;  %v1569_v11 = vadd.f32 1.0, %v3015_v8  ;;  %v2759_v8 = vpack.c.bf16 %v1875_v1, %v1873_v62  ;;  %v2777_v62 = vpack.c.bf16 %v1896_v57, %v1894_v61  ;;  %v2841_v1 = vpack.c.bf16 %v1960_v10, %v1958_v59  ;;  %v1605_v57 = vpop.permute.xlu0 %1604 }
0x19b8   :  { %v1568_v12 = vadd.f32 1.0, %v3017_v9  ;;  %v2823_v9 = vpack.c.bf16 %v1939_v4, %v1937_v46  ;;  %v1898_v46 = vld [vmem:[%s4201_s16 + $0x128] sm:$0xff]  ;;  %v1900_v4 = vld [vmem:[%s4201_s16 + $0x138] sm:$0xff] }
0x19b9   :  { %3018 = vrcp.f32 %v1569_v11  ;;  %v1877_v11 = vld [vmem:[%s4201_s16 + $0x80] sm:$0xff] }
0x19ba   :  { %3020 = vrcp.f32 %v1568_v12  ;;  %v1879_v12 = vld [vmem:[%s4201_s16 + $0x90] sm:$0xff] }
0x19bb   :  { %v2763_v21 = vpack.c.bf16 %v1879_v12, %v1877_v11  ;;  %v2781_v11 = vpack.c.bf16 %v1900_v4, %v1898_v46  ;;  %v1974_v46 = vld [vmem:[%s4201_s16 + $0x388] sm:$0xff] }
0x19c3   :  { %v3019_v16 = vpop.eup %3018 }
0x19c4   :  { %v3021_v18 = vpop.eup %3020  ;;  %v1589_v20 = vsub.f32 %v3019_v16, %v1585_v0  ;;  %v1941_v0 = vld [vmem:[%s4201_s16 + $0x280] sm:$0xff]  ;;  %v1943_v16 = vld [vmem:[%s4201_s16 + $0x290] sm:$0xff] }
0x19c5   :  { %v1588_v19 = vsub.f32 %v3021_v18, %v1584_v34  ;;  %v2825_v34 = vpack.c.bf16 %v1944_v49, %v1942_v43  ;;  %v1882_v18 = vld [vmem:[%s4201_s16 + $0xa8] sm:$0xff]  ;;  %v2827_v25 = vpack.c.bf16 %v1943_v16, %v1941_v0  ;;  %v1904_v16 = vld [vmem:[%s4201_s16 + $0x158] sm:$0xff] }
0x19c6   :  { %v1613_v39 = vmul.f32 %v1600_v26, %v1589_v20  ;;  %v1948_v20 = vld [vmem:[%s4201_s16 + $0x2b8] sm:$0xff]  ;;  %v1881_v26 = vld [vmem:[%s4201_s16 + $0xa0] sm:$0xff]  ;;  %v1902_v0 = vld [vmem:[%s4201_s16 + $0x148] sm:$0xff] }
0x19c7   :  { %v1612_v14 = vmul.f32 %v1595_v7, %v1588_v19  ;;  %v2761_v7 = vpack.c.bf16 %v1880_v6, %v1878_v5  ;;  %v1946_v19 = vld [vmem:[%s4201_s16 + $0x2a8] sm:$0xff]  ;;  %v1964_v6 = vld [vmem:[%s4201_s16 + $0x338] sm:$0xff] }
0x19c8   :  { %v1621_v54 = vmul.f32 %v1617_v38, %v1613_v39  ;;  %v2829_v30 = vpack.c.bf16 %v1948_v20, %v1946_v19  ;;  %v1952_v38 = vld [vmem:[%s4201_s16 + $0x2d8] sm:$0xff]  ;;  %v2767_v39 = vpack.c.bf16 %v1883_v27, %v1881_v26  ;;  %v1962_v5 = vld [vmem:[%s4201_s16 + $0x328] sm:$0xff]  ;;  %v2785_v26 = vpack.c.bf16 %v1904_v16, %v1902_v0 }
0x19c9   :  { %v1620_v37 = vmul.f32 %v1616_v17, %v1612_v14  ;;  %v1884_v17 = vld [vmem:[%s4201_s16 + $0xb8] sm:$0xff]  ;;  %v1945_v14 = vld [vmem:[%s4201_s16 + $0x2a0] sm:$0xff]  ;;  %v2845_v12 = vpack.c.bf16 %v1964_v6, %v1962_v5  ;;  %v1978_v0 = vld [vmem:[%s4201_s16 + $0x3a8] sm:$0xff] }
0x19ca   :  { %v2765_v28 = vpack.c.bf16 %v1884_v17, %v1882_v18  ;;  %v1966_v18 = vld [vmem:[%s4201_s16 + $0x348] sm:$0xff]  ;;  %v1968_v17 = vld [vmem:[%s4201_s16 + $0x358] sm:$0xff] }
0x19cb   :  { %2384 = vmatmul.mubr.msk.f32.vlgmr.msra.gmra.mrb[24].mxu0 %vm1654_vm2, %v1620_v37  ;;  %2388 = vmatmul.mubr.msk.f32.vlgmr.msra.gmra.mrb[8].mxu1 %vm1654_vm2, %v1620_v37  ;;  %v1950_v37 = vld [vmem:[%s4201_s16 + $0x2c8] sm:$0xff]  ;;  %v2849_v27 = vpack.c.bf16 %v1968_v17, %v1966_v18  ;;  %v1976_v5 = vld [vmem:[%s4201_s16 + $0x398] sm:$0xff]  ;;  %v1913_v17 = vld [vmem:[%s4201_s16 + $0x1a0] sm:$0xff] }
0x19cc   :  { %1737 = vmatprep.mubr.f32.mxu0 %v3098_v50  ;;  %1826 = vmatprep.mubr.f32.mxu1 %v3098_v50  ;;  %v2857_v6 = vpack.c.bf16 %v1976_v5, %v1974_v46  ;;  %v1980_v18 = vld [vmem:[%s4201_s16 + $0x3b8] sm:$0xff] }
0x19cd   :  { %2748 = vmatpush1.bf16.msra.mxu1 %v2747_v33  ;;  %2812 = vmatpush1.bf16.msra.mxu0 %v2811_v32  ;;  %v2831_v33 = vpack.c.bf16 %v1947_v31, %v1945_v14  ;;  %v1885_v32 = vld [vmem:[%s4201_s16 + $0xc0] sm:$0xff]  ;;  %v1906_v14 = vld [vmem:[%s4201_s16 + $0x168] sm:$0xff]  ;;  %v1908_v31 = vld [vmem:[%s4201_s16 + $0x178] sm:$0xff] }
0x19ce   :  { %2750 = vmatprep.subr.bf16.mxu1 %v2749_v13  ;;  %2814 = vmatprep.subr.bf16.mxu0 %v2813_v29  ;;  %v2833_v13 = vpack.c.bf16 %v1952_v38, %v1950_v37  ;;  %v1949_v29 = vld [vmem:[%s4201_s16 + $0x2c0] sm:$0xff]  ;;  %v2771_v53 = vpack.c.bf16 %v1887_v40, %v1885_v32  ;;  %v2853_v32 = vpack.c.bf16 %v1972_v36, %v1970_v35  ;;  %v1907_v40 = vld [vmem:[%s4201_s16 + $0x170] sm:$0xff]  ;;  %v1984_v35 = vld [vmem:[%s4201_s16 + $0x3d8] sm:$0xff] }
0x19cf   :  { %2385 = vmatmul.mubr.msk.f32.gmra.mrb[26].mxu0 %vm1654_vm2, %v1621_v54  ;;  %2389 = vmatmul.mubr.msk.f32.gmra.mrb[10].mxu1 %vm1654_vm2, %v1621_v54  ;;  %v2835_v54 = vpack.c.bf16 %v1951_v15, %v1949_v29  ;;  %v1917_v36 = vld [vmem:[%s4201_s16 + $0x1c0] sm:$0xff] }
0x19d0   :  { %1743 = vmatprep.mubr.f32.mxu0 %v3098_v50  ;;  %1832 = vmatprep.mubr.f32.mxu1 %v3098_v50 }
0x19d1   :  { %2752 = vmatpush1.bf16.msra.mxu1 %v2751_v58  ;;  %2816 = vmatpush1.bf16.msra.mxu0 %v2815_v41  ;;  %v1889_v58 = vld [vmem:[%s4201_s16 + $0xe0] sm:$0xff]  ;;  %v1891_v41 = vld [vmem:[%s4201_s16 + $0xf0] sm:$0xff] }
0x19d2   :  { %2754 = vmatprep.subr.bf16.mxu1 %v2753_v56  ;;  %2818 = vmatprep.subr.bf16.mxu0 %v2817_v63  ;;  %v1953_v56 = vld [vmem:[%s4201_s16 + $0x2e0] sm:$0xff]  ;;  %v1955_v63 = vld [vmem:[%s4201_s16 + $0x2f0] sm:$0xff]  ;;  %v2775_v42 = vpack.c.bf16 %v1891_v41, %v1889_v58 }
0x19d3   :  { %v2839_v60 = vpack.c.bf16 %v1955_v63, %v1953_v56  ;;  %v1587_v56 = vld [vmem:[%s4203_s11 + $0x18] sm:$0xff]  ;;  %v1586_v63 = vld [vmem:[%s4203_s11 + $0x10] sm:$0xff] }
0x19d5   :  { %2756 = vmatpush1.bf16.msra.mxu1 %v2755_v24  ;;  %2820 = vmatpush1.bf16.msra.mxu0 %v2819_v48  ;;  %v1893_v24 = vld [vmem:[%s4201_s16 + $0x100] sm:$0xff]  ;;  %v1895_v48 = vld [vmem:[%s4201_s16 + $0x110] sm:$0xff] }
0x19d6   :  { %2758 = vmatprep.subr.bf16.mxu1 %v2757_v2  ;;  %2822 = vmatprep.subr.bf16.mxu0 %v2821_v23  ;;  %v1957_v2 = vld [vmem:[%s4201_s16 + $0x300] sm:$0xff]  ;;  %v1959_v23 = vld [vmem:[%s4201_s16 + $0x310] sm:$0xff]  ;;  %v2779_v43 = vpack.c.bf16 %v1895_v48, %v1893_v24  ;;  %v1610_v24 = vpop.permute.xlu1 %1609  ;;  %v1619_v48 = vld [vmem:[%s4204_s13 + $0x18] sm:$0xff] }
0x19d7   :  { %v2843_v49 = vpack.c.bf16 %v1959_v23, %v1957_v2  ;;  %v1910_v2 = vld [vmem:[%s4201_s16 + $0x188] sm:$0xff]  ;;  %v1912_v23 = vld [vmem:[%s4201_s16 + $0x198] sm:$0xff] }
0x19d8   :  { %v2793_v4 = vpack.c.bf16 %v1912_v23, %v1910_v2 }
0x19d9   :  { %2760 = vmatpush1.bf16.msra.mxu1 %v2759_v8  ;;  %2824 = vmatpush1.bf16.msra.mxu0 %v2823_v9  ;;  %v1897_v8 = vld [vmem:[%s4201_s16 + $0x120] sm:$0xff]  ;;  %v1899_v9 = vld [vmem:[%s4201_s16 + $0x130] sm:$0xff] }
0x19da   :  { %2762 = vmatprep.subr.bf16.mxu1 %v2761_v7  ;;  %2826 = vmatprep.subr.bf16.mxu0 %v2825_v34  ;;  %v1961_v7 = vld [vmem:[%s4201_s16 + $0x320] sm:$0xff]  ;;  %v1963_v34 = vld [vmem:[%s4201_s16 + $0x330] sm:$0xff]  ;;  %v2783_v19 = vpack.c.bf16 %v1899_v9, %v1897_v8 }
0x19db   :  { %v2847_v20 = vpack.c.bf16 %v1963_v34, %v1961_v7  ;;  %v1973_v8 = vld [vmem:[%s4201_s16 + $0x380] sm:$0xff]  ;;  %v1914_v7 = vld [vmem:[%s4201_s16 + $0x1a8] sm:$0xff]  ;;  %v1916_v34 = vld [vmem:[%s4201_s16 + $0x1b8] sm:$0xff] }
0x19dc   :  { %v2797_v16 = vpack.c.bf16 %v1916_v34, %v1914_v7 }
0x19dd   :  { %2764 = vmatpush1.bf16.msra.mxu1 %v2763_v21  ;;  %2828 = vmatpush1.bf16.msra.mxu0 %v2827_v25  ;;  %v1901_v21 = vld [vmem:[%s4201_s16 + $0x140] sm:$0xff]  ;;  %v1903_v25 = vld [vmem:[%s4201_s16 + $0x150] sm:$0xff] }
0x19de   :  { %2766 = vmatprep.subr.bf16.mxu1 %v2765_v28  ;;  %2830 = vmatprep.subr.bf16.mxu0 %v2829_v30  ;;  %v1965_v28 = vld [vmem:[%s4201_s16 + $0x340] sm:$0xff]  ;;  %v1967_v30 = vld [vmem:[%s4201_s16 + $0x350] sm:$0xff]  ;;  %v2787_v37 = vpack.c.bf16 %v1903_v25, %v1901_v21 }
0x19df   :  { %v2851_v38 = vpack.c.bf16 %v1967_v30, %v1965_v28  ;;  %v1977_v25 = vld [vmem:[%s4201_s16 + $0x3a0] sm:$0xff]  ;;  %v1918_v28 = vld [vmem:[%s4201_s16 + $0x1c8] sm:$0xff]  ;;  %v1920_v30 = vld [vmem:[%s4201_s16 + $0x1d8] sm:$0xff] }
0x19e1   :  { %2768 = vmatpush1.bf16.msra.mxu1 %v2767_v39  ;;  %2832 = vmatpush1.bf16.msra.mxu0 %v2831_v33  ;;  %v1905_v39 = vld [vmem:[%s4201_s16 + $0x160] sm:$0xff]  ;;  %v2789_v33 = vpack.c.bf16 %v1908_v31, %v1906_v14  ;;  %v1982_v14 = vld [vmem:[%s4201_s16 + $0x3c8] sm:$0xff]  ;;  %v2801_v31 = vpack.c.bf16 %v1920_v30, %v1918_v28 }
0x19e2   :  { %2770 = vmatprep.subr.bf16.mxu1 %v2769_v44  ;;  %2834 = vmatprep.subr.bf16.mxu0 %v2833_v13  ;;  %v1969_v44 = vld [vmem:[%s4201_s16 + $0x360] sm:$0xff]  ;;  %v1971_v13 = vld [vmem:[%s4201_s16 + $0x370] sm:$0xff]  ;;  %v2791_v29 = vpack.c.bf16 %v1907_v40, %v1905_v39 }
0x19e3   :  { %v2855_v15 = vpack.c.bf16 %v1971_v13, %v1969_v44  ;;  %v1922_v44 = vld [vmem:[%s4201_s16 + $0x1e8] sm:$0xff]  ;;  %v1924_v13 = vld [vmem:[%s4201_s16 + $0x1f8] sm:$0xff]  ;;  %v2207_v30 = vld [vmem:[%s4205_s18 + $0xa0] sm:$0xff] }
0x19e5   :  { %2772 = vmatpush1.bf16.msra.mxu1 %v2771_v53  ;;  %2836 = vmatpush1.bf16.msra.mxu0 %v2835_v54 }
0x19e6   :  { %2774 = vmatprep.subr.bf16.mxu1 %v2773_v22  ;;  %2838 = vmatprep.subr.bf16.mxu0 %v2837_v55 }
0x19e9   :  { %2776 = vmatpush1.bf16.msra.mxu1 %v2775_v42  ;;  %2840 = vmatpush1.bf16.msra.mxu0 %v2839_v60  ;;  %v1618_v42 = vld [vmem:[%s4204_s13 + $0x10] sm:$0xff] }
0x19ea   :  { %2778 = vmatprep.subr.bf16.mxu1 %v2777_v62  ;;  %2842 = vmatprep.subr.bf16.mxu0 %v2841_v1 }
0x19ed   :  { %2780 = vmatpush1.bf16.msra.mxu1 %v2779_v43  ;;  %2844 = vmatpush1.bf16.msra.mxu0 %v2843_v49  ;;  %v1909_v43 = vld [vmem:[%s4201_s16 + $0x180] sm:$0xff]  ;;  %v1911_v49 = vld [vmem:[%s4201_s16 + $0x190] sm:$0xff] }
0x19ee   :  { %2782 = vmatprep.subr.bf16.mxu1 %v2781_v11  ;;  %2846 = vmatprep.subr.bf16.mxu0 %v2845_v12  ;;  %v2795_v11 = vpack.c.bf16 %v1911_v49, %v1909_v43 }
0x19f1   :  { %2784 = vmatpush1.bf16.msra.mxu1 %v2783_v19  ;;  %2848 = vmatpush1.bf16.msra.mxu0 %v2847_v20  ;;  %v1915_v19 = vld [vmem:[%s4201_s16 + $0x1b0] sm:$0xff]  ;;  %v2861_v20 = vpack.c.bf16 %v1980_v18, %v1978_v0  ;;  %v2187_v0 = vld [vmem:[%s4205_s18] sm:$0xff] }
0x19f2   :  { %2786 = vmatprep.subr.bf16.mxu1 %v2785_v26  ;;  %2850 = vmatprep.subr.bf16.mxu0 %v2849_v27  ;;  %v2799_v21 = vpack.c.bf16 %v1915_v19, %v1913_v17  ;;  %v1979_v26 = vld [vmem:[%s4201_s16 + $0x3b0] sm:$0xff]  ;;  %v2206_v17 = vld [vmem:[%s4205_s18 + $0x98] sm:$0xff] }
0x19f3   :  { %v2863_v27 = vpack.c.bf16 %v1979_v26, %v1977_v25  ;;  %v2205_v18 = vld [vmem:[%s4205_s18 + $0x90] sm:$0xff] }
0x19f4   :  { %v2877_v25 = vpack.c.bf16 %v2206_v17, %v2205_v18  ;;  %v2189_v26 = vld [vmem:[%s4205_s18 + $0x10] sm:$0xff]  ;;  %v2198_v18 = vld [vmem:[%s4205_s18 + $0x58] sm:$0xff] }
0x19f5   :  { %2788 = vmatpush1.bf16.msra.mxu1 %v2787_v37  ;;  %2852 = vmatpush1.bf16.msra.mxu0 %v2851_v38  ;;  %v1919_v37 = vld [vmem:[%s4201_s16 + $0x1d0] sm:$0xff]  ;;  %v2865_v38 = vpack.c.bf16 %v1984_v35, %v1982_v14  ;;  %v2208_v14 = vld [vmem:[%s4205_s18 + $0xa8] sm:$0xff] }
0x19f6   :  { %2790 = vmatprep.subr.bf16.mxu1 %v2789_v33  ;;  %2854 = vmatprep.subr.bf16.mxu0 %v2853_v32  ;;  %v2803_v39 = vpack.c.bf16 %v1919_v37, %v1917_v36  ;;  %v1981_v33 = vld [vmem:[%s4201_s16 + $0x3c0] sm:$0xff]  ;;  %v1983_v32 = vld [vmem:[%s4201_s16 + $0x3d0] sm:$0xff] }
0x19f7   :  { %v2867_v40 = vpack.c.bf16 %v1983_v32, %v1981_v33  ;;  %v2192_v33 = vld [vmem:[%s4205_s18 + $0x28] sm:$0xff] }
0x19f9   :  { %v2656_v45 = vpop.f32.mrb[22].mxu0  ;;  %2792 = vmatpush1.bf16.msra.mxu1 %v2791_v29  ;;  %2856 = vmatpush1.bf16.msra.mxu0 %v2855_v15  ;;  %v1986_v29 = vld [vmem:[%s4201_s16 + $0x3e8] sm:$0xff]  ;;  %v2805_v15 = vpack.c.bf16 %v1924_v13, %v1922_v44  ;;  %v2210_v44 = vld [vmem:[%s4205_s18 + $0xb8] sm:$0xff] }
0x19fa   :  { %v1553_v47 = vadd.f32 %v2656_v45, %v3614_v3  ;;  %v1547_v51 = vpop.f32.mrb[23].mxu0  ;;  %2794 = vmatprep.subr.bf16.mxu1 %v2793_v4  ;;  %2858 = vmatprep.subr.bf16.mxu0 %v2857_v6  ;;  %v1988_v45 = vld [vmem:[%s4201_s16 + $0x3f8] sm:$0xff] }
0x19fb   :  { %v1548_v52 = vadd.f32 %v3614_v3, %v1547_v51  ;;  %v1923_v51 = vld [vmem:[%s4201_s16 + $0x1f0] sm:$0xff] }
0x19fc   :  { %v2383_v53 = vmul.f32 -1.442695, %v1553_v47  ;;  %v1921_v47 = vld [vmem:[%s4201_s16 + $0x1e0] sm:$0xff] }
0x19fd   :  { %v2382_v54 = vmul.f32 -1.442695, %v1548_v52  ;;  %2796 = vmatpush1.bf16.msra.mxu1 %v2795_v11  ;;  %v2869_v52 = vpack.c.bf16 %v1988_v45, %v1986_v29  ;;  %v2193_v45 = vld [vmem:[%s4205_s18 + $0x30] sm:$0xff] }
0x19fe   :  { %3022 = vpow2.f32 %v2383_v53  ;;  %2798 = vmatprep.subr.bf16.mxu1 %v2797_v16  ;;  %v2807_v53 = vpack.c.bf16 %v1923_v51, %v1921_v47  ;;  %v2188_v16 = vld [vmem:[%s4205_s18 + $0x8] sm:$0xff]  ;;  %v2194_v47 = vld [vmem:[%s4205_s18 + $0x38] sm:$0xff] }
0x19ff   :  { %3024 = vpow2.f32 %v2382_v54  ;;  %v1985_v54 = vld [vmem:[%s4201_s16 + $0x3e0] sm:$0xff]  ;;  %v2887_v51 = vpack.c.bf16 %v2194_v47, %v2193_v45 }
0x1a01   :  { %2800 = vmatpush1.bf16.msra.mxu1 %v2799_v21 }
0x1a02   :  { %2802 = vmatprep.subr.bf16.mxu1 %v2801_v31 }
0x1a05   :  { %2804 = vmatpush1.bf16.msra.mxu1 %v2803_v39  ;;  %v2191_v39 = vld [vmem:[%s4205_s18 + $0x20] sm:$0xff] }
0x1a06   :  { %2806 = vmatprep.subr.bf16.mxu1 %v2805_v15  ;;  %v2883_v29 = vpack.c.bf16 %v2192_v33, %v2191_v39 }
0x1a08   :  { %v3023_v58 = vpop.eup %3022 }
0x1a09   :  { %v3025_v41 = vpop.eup %3024  ;;  %v1571_v22 = vadd.f32 1.0, %v3023_v58  ;;  %v1987_v58 = vld [vmem:[%s4201_s16 + $0x3f0] sm:$0xff]  ;;  %2808 = vmatpush1.bf16.msra.mxu1 %v2807_v53 }
0x1a0a   :  { %v1570_v55 = vadd.f32 1.0, %v3025_v41  ;;  %v2871_v41 = vpack.c.bf16 %v1987_v58, %v1985_v54 }
0x1a0b   :  { %3026 = vrcp.f32 %v1571_v22  ;;  %v2203_v22 = vld [vmem:[%s4205_s18 + $0x80] sm:$0xff] }
0x1a0c   :  { %3028 = vrcp.f32 %v1570_v55  ;;  %v2204_v55 = vld [vmem:[%s4205_s18 + $0x88] sm:$0xff] }
0x1a15   :  { %v3027_v61 = vpop.eup %3026 }
0x1a16   :  { %v3029_v3 = vpop.eup %3028  ;;  %v1591_v59 = vsub.f32 %v3027_v61, %v1587_v56  ;;  %v2873_v56 = vpack.c.bf16 %v2204_v55, %v2203_v22 }
0x1a17   :  { %v1590_v10 = vsub.f32 %v3029_v3, %v1586_v63  ;;  %v1634_v63 = vlaneseq }
0x1a18   :  { %v1615_v62 = vmul.f32 %v1610_v24, %v1591_v59  ;;  %2874 = vmatprep.subr.bf16.mxu1 %v2873_v56 }
0x1a19   :  { %v1614_v60 = vmul.f32 %v1605_v57, %v1590_v10  ;;  %v4036_v61 = vshrl.u32 %v1634_v63, 7  ;;  %v1632_v57 = vld [vmem:[%s4206_s15] sm:$0xf] }
0x1a1a   :  { %v1623_v9 = vmul.f32 %v1619_v48, %v1615_v62 }
0x1a1b   :  { %v1622_v1 = vmul.f32 %v1618_v42, %v1614_v60  ;;  %v1636_v3 = vsub.s32 0, %v4036_v61  ;;  %v1640_v59 = vsub.s32 1, %v4036_v61  ;;  %v1648_v10 = vsub.s32 3, %v4036_v61 }
0x1a1c   :  { %v1644_v42 = vsub.s32 2, %v4036_v61 }
0x1a1d   :  { %2386 = vmatmul.mubr.msk.f32.gmra.mrb[28].mxu0 %vm1654_vm2, %v1622_v1  ;;  %2390 = vmatmul.mubr.msk.f32.gmra.mrb[12].mxu1 %vm1654_vm2, %v1622_v1  ;;  %v4047_v60 = vrot.slane %v1632_v57, %v1636_v3  ;;  %v4051_v24 = vrot.slane %v1632_v57, %v1640_v59  ;;  %v4053_v48 = vrot.slane %v1632_v57, %v1648_v10 }
0x1a1e   :  { %1749 = vmatprep.mubr.f32.mxu0 %v3098_v50  ;;  %1838 = vmatprep.mubr.f32.mxu1 %v3098_v50  ;;  %v1975_v50 = vld [vmem:[%s4201_s16 + $0x390] sm:$0xff]  ;;  %v4055_v62 = vrot.slane %v1632_v57, %v1644_v42 }
0x1a1f   :  { %v2859_v12 = vpack.c.bf16 %v1975_v50, %v1973_v8 }
0x1a21   :  { %2387 = vmatmul.mubr.msk.f32.gmra.mrb[30].mxu0 %vm1654_vm2, %v1623_v9  ;;  %2391 = vmatmul.mubr.msk.f32.gmra.mrb[14].mxu1 %vm1654_vm2, %v1623_v9 }
0x1a22   :  { %2860 = vmatpush1.bf16.msra.mxu0 %v2859_v12 }
0x1a23   :  { %2862 = vmatprep.subr.bf16.mxu0 %v2861_v20  ;;  %v2875_v20 = vpack.c.bf16 %v2188_v16, %v2187_v0  ;;  %v2197_v16 = vld [vmem:[%s4205_s18 + $0x50] sm:$0xff] }
0x1a24   :  { %v2895_v17 = vpack.c.bf16 %v2198_v18, %v2197_v16 }
0x1a26   :  { %2864 = vmatpush1.bf16.msra.mxu0 %v2863_v27  ;;  %v2190_v27 = vld [vmem:[%s4205_s18 + $0x18] sm:$0xff] }
0x1a27   :  { %2866 = vmatprep.subr.bf16.mxu0 %v2865_v38  ;;  %v2879_v36 = vpack.c.bf16 %v2190_v27, %v2189_v26  ;;  %v2881_v38 = vpack.c.bf16 %v2208_v14, %v2207_v30  ;;  %v2200_v26 = vld [vmem:[%s4205_s18 + $0x68] sm:$0xff]  ;;  %v2218_v30 = vld [vmem:[%s4205_s18 + $0xf8] sm:$0xff]  ;;  %v2201_v14 = vld [vmem:[%s4205_s18 + $0x70] sm:$0xff] }
0x1a2a   :  { %2868 = vmatpush1.bf16.msra.mxu0 %v2867_v40  ;;  %v2209_v40 = vld [vmem:[%s4205_s18 + $0xb0] sm:$0xff] }
0x1a2b   :  { %2870 = vmatprep.subr.bf16.mxu0 %v2869_v52  ;;  %v2885_v15 = vpack.c.bf16 %v2210_v44, %v2209_v40 }
0x1a2e   :  { %2872 = vmatpush1.bf16.msra.mxu0 %v2871_v41 }
0x1a9e   :  { %v1733_v1 = vpop.f32.mrb[24].mxu0  ;;  %v1822_v2 = vpop.f32.mrb[8].mxu1 }
0x1a9f   :  { %v1734_v23 = vadd.f32 %v1733_v1, %v4047_v60  ;;  %v1735_v46 = vpop.f32.mrb[25].mxu0  ;;  %v1824_v4 = vpop.f32.mrb[9].mxu1  ;;  %v1823_v43 = vadd.f32 %v1822_v2, %v4055_v62 }
0x1aa0   :  { %v1736_v5 = vadd.f32 %v1735_v46, %v4051_v24  ;;  %v1825_v6 = vadd.f32 %v1824_v4, %v4053_v48 }
0x1aa1   :  { %3030 = vtanh.f32 %v1734_v23 }
0x1aa2   :  { %v1739_v49 = vpop.f32.mrb[26].mxu0  ;;  %v1828_v8 = vpop.f32.mrb[10].mxu1  ;;  %3032 = vtanh.f32 %v1736_v5 }
0x1aa3   :  { %v1740_v9 = vadd.f32 %v1739_v49, %v4047_v60  ;;  %v1741_v11 = vpop.f32.mrb[27].mxu0  ;;  %v1830_v50 = vpop.f32.mrb[11].mxu1  ;;  %3034 = vtanh.f32 %v1825_v6  ;;  %v1829_v34 = vadd.f32 %v1828_v8, %v4055_v62  ;;  %v2195_v8 = vld [vmem:[%s4205_s18 + $0x40] sm:$0xff] }
0x1aa4   :  { %v1742_v12 = vadd.f32 %v1741_v11, %v4051_v24  ;;  %v1831_v7 = vadd.f32 %v1830_v50, %v4053_v48  ;;  %3036 = vtanh.f32 %v1823_v43 }
0x1aa5   :  { %3038 = vtanh.f32 %v1740_v9  ;;  %v2196_v9 = vld [vmem:[%s4205_s18 + $0x48] sm:$0xff] }
0x1aa6   :  { %3040 = vtanh.f32 %v1742_v12  ;;  %v2891_v50 = vpack.c.bf16 %v2196_v9, %v2195_v8 }
0x1aa7   :  { %3042 = vtanh.f32 %v1831_v7  ;;  %v2213_v7 = vld [vmem:[%s4205_s18 + $0xd0] sm:$0xff] }
0x1aa8   :  { %3044 = vtanh.f32 %v1829_v34  ;;  %v2214_v34 = vld [vmem:[%s4205_s18 + $0xd8] sm:$0xff] }
0x1aa9   :  { %v2893_v0 = vpack.c.bf16 %v2214_v34, %v2213_v7 }
0x1aab   :  { %v3031_v19 = vpop.eup %3030 }
0x1aac   :  { %v3033_v21 = vpop.eup %3032 }
0x1aad   :  { %v3035_v28 = vpop.eup %3034  ;;  %2065 = vmatprep.mubr.f32.mxu1 %v3033_v21 }
0x1aae   :  { %v3037_v31 = vpop.eup %3036  ;;  %2154 = vmatprep.mubr.f32.mxu0 %v3035_v28  ;;  %2066 = vmatmul.mubr.f32.vlgmr.msra.gmra.mrb[16].mxu1 %v3031_v19  ;;  %v2215_v19 = vld [vmem:[%s4205_s18 + $0xe0] sm:$0xff]  ;;  %v2217_v28 = vld [vmem:[%s4205_s18 + $0xf0] sm:$0xff] }
0x1aaf   :  { %v3039_v35 = vpop.eup %3038  ;;  %2155 = vmatmul.mubr.f32.vlgmr.msra.gmra.mrb[32].mxu0 %v3037_v31  ;;  %2876 = vmatpush3.bf16.msra.mxu1 %v2875_v20  ;;  %v2216_v20 = vld [vmem:[%s4205_s18 + $0xe8] sm:$0xff]  ;;  %v2901_v31 = vpack.c.bf16 %v2218_v30, %v2217_v28 }
0x1ab0   :  { %v3041_v37 = vpop.eup %3040  ;;  %2878 = vmatprep.subr.bf16.mxu1 %v2877_v25  ;;  %v2897_v21 = vpack.c.bf16 %v2216_v20, %v2215_v19  ;;  %v2199_v25 = vld [vmem:[%s4205_s18 + $0x60] sm:$0xff] }
0x1ab1   :  { %v3043_v32 = vpop.eup %3042  ;;  %2071 = vmatprep.mubr.f32.mxu1 %v3041_v37  ;;  %v2899_v27 = vpack.c.bf16 %v2200_v26, %v2199_v25  ;;  %v1989_v37 = vld [vmem:[%s4207_s17] sm:$0x3] }
0x1ab2   :  { %v3045_v13 = vpop.eup %3044  ;;  %2160 = vmatprep.mubr.f32.mxu0 %v3043_v32  ;;  %2072 = vmatmul.mubr.f32.gmra.mrb[18].mxu1 %v3039_v35  ;;  %v2202_v35 = vld [vmem:[%s4205_s18 + $0x78] sm:$0xff]  ;;  %v1998_v39 = vrot.slane %v1989_v37, %v1640_v59 }
0x1ab3   :  { %2161 = vmatmul.mubr.f32.gmra.mrb[34].mxu0 %v3045_v13  ;;  %2880 = vmatpush3.bf16.msra.mxu1 %v2879_v36  ;;  %v2903_v36 = vpack.c.bf16 %v2202_v35, %v2201_v14 }
0x1ab4   :  { %2882 = vmatprep.subr.bf16.mxu1 %v2881_v38  ;;  %v1994_v38 = vrot.slane %v1989_v37, %v1636_v3 }
0x1ab7   :  { %2884 = vmatpush3.bf16.msra.mxu1 %v2883_v29 }
0x1ab8   :  { %2886 = vmatprep.subr.bf16.mxu1 %v2885_v15 }
0x1abb   :  { %2888 = vmatpush3.bf16.msra.mxu1 %v2887_v51 }
0x1af0   :  { %v1745_v52 = vpop.f32.mrb[28].mxu0  ;;  %v1834_v53 = vpop.f32.mrb[12].mxu1 }
0x1af1   :  { %v1746_v54 = vadd.f32 %v1745_v52, %v4047_v60  ;;  %v1747_v58 = vpop.f32.mrb[29].mxu0  ;;  %v1836_v41 = vpop.f32.mrb[13].mxu1  ;;  %v1835_v56 = vadd.f32 %v1834_v53, %v4055_v62 }
0x1af2   :  { %v1748_v22 = vadd.f32 %v1747_v58, %v4051_v24  ;;  %v1837_v55 = vadd.f32 %v1836_v41, %v4053_v48 }
0x1af3   :  { %3046 = vtanh.f32 %v1746_v54 }
0x1af4   :  { %v1751_v63 = vpop.f32.mrb[30].mxu0  ;;  %v1840_v57 = vpop.f32.mrb[14].mxu1  ;;  %3048 = vtanh.f32 %v1748_v22 }
0x1af5   :  { %v1752_v10 = vadd.f32 %v1751_v63, %v4047_v60  ;;  %v1753_v42 = vpop.f32.mrb[31].mxu0  ;;  %v1842_v1 = vpop.f32.mrb[15].mxu1  ;;  %3050 = vtanh.f32 %v1837_v55  ;;  %v1841_v46 = vadd.f32 %v1840_v57, %v4055_v62 }
0x1af6   :  { %v1754_v2 = vadd.f32 %v1753_v42, %v4051_v24  ;;  %v1843_v23 = vadd.f32 %v1842_v1, %v4053_v48  ;;  %3052 = vtanh.f32 %v1835_v56  ;;  %v2211_v24 = vld [vmem:[%s4205_s18 + $0xc0] sm:$0xff]  ;;  %v2212_v48 = vld [vmem:[%s4205_s18 + $0xc8] sm:$0xff] }
0x1af7   :  { %3054 = vtanh.f32 %v1752_v10  ;;  %v2889_v49 = vpack.c.bf16 %v2212_v48, %v2211_v24 }
0x1af8   :  { %3056 = vtanh.f32 %v1754_v2 }
0x1af9   :  { %3058 = vtanh.f32 %v1843_v23  ;;  %2890 = vmatprep.subr.bf16.mxu1 %v2889_v49 }
0x1afa   :  { %3060 = vtanh.f32 %v1841_v46  ;;  %2892 = vmatpush3.bf16.msra.mxu1 %v2891_v50  ;;  %v2392_v50 = vld [vmem:[%s4208_s19] ss:$0 sm:$0xff] }
0x1afb   :  { %2894 = vmatprep.subr.bf16.mxu1 %v2893_v0 }
0x1afd   :  { %v3047_v4 = vpop.eup %3046 }
0x1afe   :  { %v3049_v5 = vpop.eup %3048  ;;  %2896 = vmatpush3.bf16.msra.mxu1 %v2895_v17 }
0x1aff   :  { %v3051_v6 = vpop.eup %3050  ;;  %2077 = vmatprep.mubr.f32.mxu1 %v3049_v5  ;;  %2898 = vmatprep.subr.bf16.mxu1 %v2897_v21 }
0x1b00   :  { %v3053_v43 = vpop.eup %3052  ;;  %2166 = vmatprep.mubr.f32.mxu0 %v3051_v6  ;;  %2078 = vmatmul.mubr.f32.gmra.mrb[20].mxu1 %v3047_v4 }
0x1b01   :  { %v3055_v60 = vpop.eup %3054  ;;  %2167 = vmatmul.mubr.f32.gmra.mrb[36].mxu0 %v3053_v43 }
0x1b02   :  { %v3057_v62 = vpop.eup %3056  ;;  %2900 = vmatpush3.bf16.msra.mxu1 %v2899_v27 }
0x1b03   :  { %v3059_v11 = vpop.eup %3058  ;;  %2083 = vmatprep.mubr.f32.mxu1 %v3057_v62  ;;  %2902 = vmatprep.subr.bf16.mxu1 %v2901_v31 }
0x1b04   :  { %v3061_v12 = vpop.eup %3060  ;;  %2172 = vmatprep.mubr.f32.mxu0 %v3059_v11  ;;  %2084 = vmatmul.mubr.f32.gmra.mrb[22].mxu1 %v3055_v60 }
0x1b05   :  { %2173 = vmatmul.mubr.f32.gmra.mrb[38].mxu0 %v3061_v12 }
0x1b06   :  { %2904 = vmatpush3.bf16.msra.mxu1 %v2903_v36 }
0x1b81   :  { %v2067_v33 = vpop.f32.mrb[16].mxu1 }
0x1b82   :  { %v2068_v32 = vadd.f32 %v2067_v33, %v1994_v38  ;;  %v2156_v40 = vpop.f32.mrb[32].mxu0  ;;  %v2069_v44 = vpop.f32.mrb[17].mxu1 }
0x1b83   :  { %v2070_v13 = vadd.f32 %v2069_v44, %v1998_v39  ;;  %v2158_v29 = vpop.f32.mrb[33].mxu0 }
0x1b84   :  { %v2157_v15 = vadd.f32 %v2156_v40, %v2068_v32 }
0x1b85   :  { %v2159_v45 = vadd.f32 %v2158_v29, %v2070_v13  ;;  %v2073_v47 = vpop.f32.mrb[18].mxu1 }
0x1b86   :  { %v2074_v51 = vadd.f32 %v2073_v47, %v1994_v38  ;;  %v2162_v52 = vpop.f32.mrb[34].mxu0  ;;  %v2075_v53 = vpop.f32.mrb[19].mxu1 }
0x1b87   :  { %3062 = vtanh.f32 %v2159_v45  ;;  %v2076_v54 = vadd.f32 %v2075_v53, %v1998_v39  ;;  %v2164_v58 = vpop.f32.mrb[35].mxu0 }
0x1b88   :  { %3064 = vtanh.f32 %v2157_v15  ;;  %v2163_v3 = vadd.f32 %v2162_v52, %v2074_v51 }
0x1b89   :  { %v2165_v41 = vadd.f32 %v2164_v58, %v2076_v54 }
0x1b8b   :  { %3066 = vtanh.f32 %v2165_v41 }
0x1b8c   :  { %3068 = vtanh.f32 %v2163_v3 }
0x1b91   :  { %v3063_v61 = vpop.eup %3062 }
0x1b92   :  { %v3065_v59 = vpop.eup %3064  ;;  %2290 = vmatprep.mubr.f32.mxu1 %v3063_v61 }
0x1b93   :  { %2291 = vmatmul.mubr.f32.vlgmr.msra.gmra.mrb[24].mxu1 %v3065_v59 }
0x1b95   :  { %v3067_v22 = vpop.eup %3066 }
0x1b96   :  { %v3069_v55 = vpop.eup %3068  ;;  %2295 = vmatprep.mubr.f32.mxu1 %v3067_v22 }
0x1b97   :  { %2296 = vmatmul.mubr.f32.gmra.mrb[26].mxu1 %v3069_v55 }
0x1bd3   :  { %v2079_v56 = vpop.f32.mrb[20].mxu1 }
0x1bd4   :  { %v2080_v63 = vadd.f32 %v2079_v56, %v1994_v38  ;;  %v2168_v57 = vpop.f32.mrb[36].mxu0  ;;  %v2081_v10 = vpop.f32.mrb[21].mxu1 }
0x1bd5   :  { %v2082_v42 = vadd.f32 %v2081_v10, %v1998_v39  ;;  %v2170_v1 = vpop.f32.mrb[37].mxu0 }
0x1bd6   :  { %v2169_v2 = vadd.f32 %v2168_v57, %v2080_v63 }
0x1bd7   :  { %v2171_v23 = vadd.f32 %v2170_v1, %v2082_v42  ;;  %v2085_v46 = vpop.f32.mrb[22].mxu1 }
0x1bd8   :  { %v2086_v4 = vadd.f32 %v2085_v46, %v1994_v38  ;;  %v2174_v5 = vpop.f32.mrb[38].mxu0  ;;  %v2087_v6 = vpop.f32.mrb[23].mxu1 }
0x1bd9   :  { %3070 = vtanh.f32 %v2171_v23  ;;  %v2088_v43 = vadd.f32 %v2087_v6, %v1998_v39  ;;  %v2176_v60 = vpop.f32.mrb[39].mxu0 }
0x1bda   :  { %3072 = vtanh.f32 %v2169_v2  ;;  %v2175_v24 = vadd.f32 %v2174_v5, %v2086_v4 }
0x1bdb   :  { %v2177_v48 = vadd.f32 %v2176_v60, %v2088_v43 }
0x1bdd   :  { %3074 = vtanh.f32 %v2177_v48 }
0x1bde   :  { %3076 = vtanh.f32 %v2175_v24 }
0x1be3   :  { %v3071_v62 = vpop.eup %3070 }
0x1be4   :  { %v3073_v49 = vpop.eup %3072  ;;  %2300 = vmatprep.mubr.f32.mxu1 %v3071_v62 }
0x1be5   :  { %2301 = vmatmul.mubr.f32.gmra.mrb[28].mxu1 %v3073_v49 }
0x1be7   :  { %v3075_v8 = vpop.eup %3074 }
0x1be8   :  { %v3077_v9 = vpop.eup %3076  ;;  %2305 = vmatprep.mubr.f32.mxu1 %v3075_v8 }
0x1be9   :  { %2306 = vmatmul.mubr.f32.gmra.mrb[30].mxu1 %v3077_v9 }
0x1c66   :  { %v2501_v11 = vpop.f32.mrb[24].mxu1 }
0x1c67   :  { %v2502_v12 = vpop.f32.mrb[25].mxu1 }
0x1c68   :  { %v2503_v7 = vadd.f32 %v2502_v12, %v2501_v11 }
0x1c6a   :  { %v2293_v34 = vadd.f32 %v2503_v7, %v2392_v50  ;;  %v2504_v0 = vpop.f32.mrb[26].mxu1 }
0x1c6b   :  { %v2505_v16 = vpop.f32.mrb[27].mxu1 }
0x1c6c   :  { %v2393_v18 = vmul.f32 -1.442695, %v2293_v34  ;;  %v2506_v17 = vadd.f32 %v2505_v16, %v2504_v0 }
0x1c6e   :  { %3078 = vpow2.f32 %v2393_v18  ;;  %v2298_v19 = vadd.f32 %v2506_v17, %v2392_v50 }
0x1c70   :  { %v2394_v20 = vmul.f32 -1.442695, %v2298_v19 }
0x1c72   :  { %3080 = vpow2.f32 %v2394_v20 }
0x1c78   :  { %v3079_v21 = vpop.eup %3078 }
0x1c79   :  { %v2323_v25 = vadd.f32 1.0, %v3079_v21 }
0x1c7b   :  { %3082 = vrcp.f32 %v2323_v25 }
0x1c7c   :  { %v3081_v26 = vpop.eup %3080 }
0x1c7d   :  { %v2324_v27 = vadd.f32 1.0, %v3081_v26 }
0x1c7f   :  { %3084 = vrcp.f32 %v2324_v27 }
0x1c85   :  { %v3083_v28 = vpop.eup %3082 }
0x1c86   :  { %2336 = vst.msk [vmem:[%s4209_s20] sm:$0xff] %vm2335_vm3, %v3083_v28 }
0x1c89   :  { %v3085_v30 = vpop.eup %3084 }
0x1c8a   :  { %2337 = vst.msk [vmem:[%s4209_s20 + $0x8] sm:$0xff] %vm2335_vm3, %v3085_v30 }
0x1cb8   :  { %v2507_v14 = vpop.f32.mrb[28].mxu1 }
0x1cb9   :  { %v2508_v31 = vpop.f32.mrb[29].mxu1 }
0x1cba   :  { %v2509_v35 = vadd.f32 %v2508_v31, %v2507_v14 }
0x1cbc   :  { %v2303_v36 = vadd.f32 %v2509_v35, %v2392_v50  ;;  %v2510_v37 = vpop.f32.mrb[30].mxu1 }
0x1cbd   :  { %v2511_v38 = vpop.f32.mrb[31].mxu1 }
0x1cbe   :  { %v2395_v39 = vmul.f32 -1.442695, %v2303_v36  ;;  %v2512_v33 = vadd.f32 %v2511_v38, %v2510_v37 }
0x1cc0   :  { %3086 = vpow2.f32 %v2395_v39  ;;  %v2308_v32 = vadd.f32 %v2512_v33, %v2392_v50 }
0x1cc2   :  { %v2396_v40 = vmul.f32 -1.442695, %v2308_v32 }
0x1cc4   :  { %3088 = vpow2.f32 %v2396_v40 }
0x1cca   :  { %v3087_v44 = vpop.eup %3086 }
0x1ccb   :  { %v2325_v13 = vadd.f32 1.0, %v3087_v44 }
0x1ccd   :  { %3090 = vrcp.f32 %v2325_v13 }
0x1cce   :  { %v3089_v29 = vpop.eup %3088 }
0x1ccf   :  { %v2326_v15 = vadd.f32 1.0, %v3089_v29 }
0x1cd1   :  { %3092 = vrcp.f32 %v2326_v15 }
0x1cd7   :  { %v3091_v45 = vpop.eup %3090 }
0x1cd8   :  { %2338 = vst.msk [vmem:[%s4209_s20 + $0x10] sm:$0xff] %vm2335_vm3, %v3091_v45 }
0x1cdb   :  { %v3093_v47 = vpop.eup %3092 }
0x1cdc   :  { %2339 = vst.msk [vmem:[%s4209_s20 + $0x18] sm:$0xff] %vm2335_vm3, %v3093_v47 }

</bundles_post_ra>
